<compile_context>
chip_gen: v7x
topology: tpu7x:2x2x1
jax: 0.10.0
libtpu: 0.0.40
codegen_flags: <defaults>
</compile_context>

<pallas_src>
import jax
import jax.numpy as jnp
import numpy as np
from jax.experimental import pallas as pl
from jax.experimental.pallas import tpu as pltpu

# ----- small, deterministic hyper-parameters consistent with the module -----
BATCH = 2
NUM_CLASSES = 4          # num_classes
NUM_CAPS = 8             # num_capsuel (capsules from PrimaryCaps)
IN_CAP_DIM = 8           # in_capsuel_dim
OUT_CAP_DIM = 16         # out_capsuel_dim
NUM_ROUTING = 3          # num_routing
ROUTING_BIAS = 0.1       # routing_bias (a plain float scalar in the module)


def digitcaps_kernel(x_ref, w_ref, v_ref):
    """Whole-batch dynamic routing in one invocation.

    x_ref: (NUM_CAPS, B, IN_CAP_DIM)             input capsules (batch on axis 1)
    w_ref: (NUM_CAPS, IN_CAP_DIM, C * OUT_DIM)   routing weights, lane-dense
    v_ref: (NUM_CLASSES, B, OUT_CAP_DIM)         class capsules (transposed back
                                                 to (B, C, OUT) in the wrapper)
    """
    x = x_ref[...].astype(jnp.float32)           # (N, B, D_in)
    w = w_ref[...].astype(jnp.float32)           # (N, D_in, C*D_out)

    # u_hat[n, b, c*D_out + o] = sum_d x[n, b, d] * W[n, d, c*D_out + o]
    # Single batched 2-D contraction (matches torch's stack/mul/sum + view,
    # since the view is a row-major split of the last axis).
    u_flat = jnp.einsum("nbd,ndk->nbk", x, w,
                        preferred_element_type=jnp.float32)   # (N, B, C*D_out)

    # Per-class prediction vectors via static lane slices (no in-kernel reshape).
    u = [u_flat[:, :, c * OUT_CAP_DIM:(c + 1) * OUT_CAP_DIM]
         for c in range(NUM_CLASSES)]                          # each (N, B, D_out)

    n_caps, bsz, _ = x.shape
    # Routing logits b_{n,b,c}; one small (N, B, 1) array per class.
    b = [jnp.zeros((n_caps, bsz, 1), jnp.float32) for _ in range(NUM_CLASSES)]

    # num_routing is a small static count -> static Python loop (unrolled).
    for it in range(NUM_ROUTING):
        # softmax over the class axis (dim=2 in the torch code), max-stabilized.
        m = b[0]
        for c in range(1, NUM_CLASSES):
            m = jnp.maximum(m, b[c])
        e = [jnp.exp(b[c] - m) for c in range(NUM_CLASSES)]
        denom = e[0]
        for c in range(1, NUM_CLASSES):
            denom = denom + e[c]
        inv_denom = pl.reciprocal(denom, approx=False)         # exact 1/x
        for c in range(NUM_CLASSES):
            coup = e[c] * inv_denom                            # (N, B, 1)
            # weighted sum of prediction vectors over input capsules + bias
            s = jnp.sum(coup * u[c], axis=0) + ROUTING_BIAS    # (B, D_out)
            if it == NUM_ROUTING - 1:
                # squash along out_capsuel_dim: v = s * ||s|| / (1 + ||s||^2)
                norm_sq = jnp.sum(s * s, axis=-1, keepdims=True)   # (B, 1)
                v = s * (jnp.sqrt(norm_sq) *
                         pl.reciprocal(1.0 + norm_sq, approx=False))
                v_ref[c] = v.astype(v_ref.dtype)
            else:
                # agreement uses the UN-squashed s, exactly as in the torch
                # module (u_hat.detach() is an autograd no-op in the forward).
                b[c] = b[c] + jnp.sum(u[c] * s[None, :, :],
                                      axis=-1, keepdims=True)  # (N, B, 1)


def digitcaps_forward(x, W):
    """x: (B, NUM_CAPS, IN_CAP_DIM), W: (NUM_CAPS, IN_CAP_DIM, C*D_out)."""
    B = x.shape[0]
    # Wrapper-side layout glue only: put the capsule axis first so the kernel
    # does one canonical batched contraction; W stays flat (trailing dim 64).
    x_nbd = jnp.transpose(x, (1, 0, 2))            # (N, B, D_in)

    v_cbo = pl.pallas_call(
        digitcaps_kernel,
        out_shape=jax.ShapeDtypeStruct((NUM_CLASSES, B, OUT_CAP_DIM),
                                       jnp.float32),
        in_specs=[
            pl.BlockSpec(memory_space=pltpu.MemorySpace.VMEM),
            pl.BlockSpec(memory_space=pltpu.MemorySpace.VMEM),
        ],
        out_specs=pl.BlockSpec(memory_space=pltpu.MemorySpace.VMEM),
    )(x_nbd, W)

    return jnp.transpose(v_cbo, (1, 0, 2))         # (B, C, D_out)


def digitcaps_reference(x, W):
    """Pure-JAX mirror of the PyTorch forward, for correctness checking."""
    B, N, _ = x.shape
    u_hat = jnp.einsum("bnd,ndk->bnk", x, W)                     # (B, N, C*Do)
    u_hat = u_hat.reshape(B, N, NUM_CLASSES, OUT_CAP_DIM)
    b = jnp.zeros((B, N, NUM_CLASSES), jnp.float32)
    v = None
    for i in range(NUM_ROUTING):
        c = jax.nn.softmax(b, axis=2)
        s = jnp.sum(c[:, :, :, None] * u_hat, axis=1) + ROUTING_BIAS
        norm = jnp.sqrt(jnp.sum(s * s, axis=2, keepdims=True))
        v = s / (1.0 + norm * norm) * norm
        if i < NUM_ROUTING - 1:
            distances = jnp.sum(u_hat * s[:, None, :, :], axis=3)
            b = b + distances
    return v


if __name__ == "__main__":
    key = jax.random.PRNGKey(0)
    kx, kw = jax.random.split(key)

    # Input capsules from PrimaryCaps.
    x = jax.random.normal(kx, (BATCH, NUM_CAPS, IN_CAP_DIM), dtype=jnp.float32)

    # Deterministic Kaiming-normal-style init of W.
    fan_in = IN_CAP_DIM * NUM_CLASSES * OUT_CAP_DIM
    std = float(np.sqrt(2.0 / fan_in))
    W = std * jax.random.normal(
        kw, (NUM_CAPS, IN_CAP_DIM, NUM_CLASSES * OUT_CAP_DIM),
        dtype=jnp.float32)

    v = jax.block_until_ready(digitcaps_forward(x, W))
    v_ref = jax.block_until_ready(digitcaps_reference(x, W))

    np.testing.assert_allclose(np.asarray(v), np.asarray(v_ref),
                               rtol=1e-5, atol=1e-5)

    print("KERNEL_OK")
</pallas_src>

<mosaic_0001>
module attributes {stable_mosaic.version = 11 : i64} {
  func.func @digitcaps_kernel(%arg0: memref<8x2x8xf32, #tpu.memory_space<vmem>>, %arg1: memref<8x8x64xf32, #tpu.memory_space<vmem>>, %arg2: memref<4x2x16xf32, #tpu.memory_space<vmem>>) attributes {dimension_semantics = [], scalar_prefetch = 0 : i64, scratch_operands = 0 : i64, tpu.core_type = #tpu.core_type<tc>} {
    %c0 = arith.constant 0 : index
    %c0_0 = arith.constant 0 : index
    %c0_1 = arith.constant 0 : index
    %0 = vector.load %arg0[%c0, %c0_0, %c0_1] : memref<8x2x8xf32, #tpu.memory_space<vmem>>, vector<8x2x8xf32>
    %c0_2 = arith.constant 0 : index
    %c0_3 = arith.constant 0 : index
    %c0_4 = arith.constant 0 : index
    %1 = vector.load %arg1[%c0_2, %c0_3, %c0_4] : memref<8x8x64xf32, #tpu.memory_space<vmem>>, vector<8x8x64xf32>
    "tpu.trace_start"() <{level = 10 : i32, message = "nbd,ndk->nbk"}> : () -> ()
    %cst = arith.constant dense<0.000000e+00> : vector<8x2x64xf32>
    %2 = tpu.matmul %0, %1, %cst {dimension_numbers = #tpu.dot_dimension_numbers<[2], [1], [1], [2], [0, 0, 0, 1, 1, 2], [0], [0]>} : vector<8x2x8xf32>, vector<8x8x64xf32>, vector<8x2x64xf32> -> vector<8x2x64xf32>
    "tpu.trace_stop"() : () -> ()
    %3 = vector.extract_strided_slice %2 {offsets = [0, 0, 0], sizes = [8, 2, 16], strides = [1, 1, 1]} : vector<8x2x64xf32> to vector<8x2x16xf32>
    %4 = vector.extract_strided_slice %2 {offsets = [0, 0, 16], sizes = [8, 2, 16], strides = [1, 1, 1]} : vector<8x2x64xf32> to vector<8x2x16xf32>
    %5 = vector.extract_strided_slice %2 {offsets = [0, 0, 32], sizes = [8, 2, 16], strides = [1, 1, 1]} : vector<8x2x64xf32> to vector<8x2x16xf32>
    %6 = vector.extract_strided_slice %2 {offsets = [0, 0, 48], sizes = [8, 2, 16], strides = [1, 1, 1]} : vector<8x2x64xf32> to vector<8x2x16xf32>
    %cst_5 = arith.constant 0.000000e+00 : f32
    %7 = vector.broadcast %cst_5 : f32 to vector<8x2x1xf32>
    %cst_6 = arith.constant 0.000000e+00 : f32
    %8 = vector.broadcast %cst_6 : f32 to vector<8x2x1xf32>
    %cst_7 = arith.constant 0.000000e+00 : f32
    %9 = vector.broadcast %cst_7 : f32 to vector<8x2x1xf32>
    %cst_8 = arith.constant 0.000000e+00 : f32
    %10 = vector.broadcast %cst_8 : f32 to vector<8x2x1xf32>
    %11 = arith.maximumf %7, %8 : vector<8x2x1xf32>
    %12 = arith.maximumf %11, %9 : vector<8x2x1xf32>
    %13 = arith.maximumf %12, %10 : vector<8x2x1xf32>
    %14 = arith.subf %7, %13 : vector<8x2x1xf32>
    %15 = math.exp %14 : vector<8x2x1xf32>
    %16 = arith.subf %8, %13 : vector<8x2x1xf32>
    %17 = math.exp %16 : vector<8x2x1xf32>
    %18 = arith.subf %9, %13 : vector<8x2x1xf32>
    %19 = math.exp %18 : vector<8x2x1xf32>
    %20 = arith.subf %10, %13 : vector<8x2x1xf32>
    %21 = math.exp %20 : vector<8x2x1xf32>
    %22 = arith.addf %15, %17 : vector<8x2x1xf32>
    %23 = arith.addf %22, %19 : vector<8x2x1xf32>
    %24 = arith.addf %23, %21 : vector<8x2x1xf32>
    %25 = tpu.reciprocal %24 : vector<8x2x1xf32> -> vector<8x2x1xf32>
    %26 = arith.mulf %15, %25 : vector<8x2x1xf32>
    %27 = vector.broadcast %26 : vector<8x2x1xf32> to vector<8x2x16xf32>
    %28 = arith.mulf %27, %3 : vector<8x2x16xf32>
    %cst_9 = arith.constant dense<0.000000e+00> : vector<2x16xf32>
    %29 = vector.multi_reduction <add>, %28, %cst_9 [0] : vector<8x2x16xf32> to vector<2x16xf32>
    %cst_10 = arith.constant 1.000000e-01 : f32
    %30 = vector.broadcast %cst_10 : f32 to vector<2x16xf32>
    %31 = arith.addf %29, %30 : vector<2x16xf32>
    %32 = vector.shape_cast %31 : vector<2x16xf32> to vector<1x2x16xf32>
    %33 = vector.broadcast %32 : vector<1x2x16xf32> to vector<8x2x16xf32>
    %34 = arith.mulf %3, %33 : vector<8x2x16xf32>
    %cst_11 = arith.constant dense<0.000000e+00> : vector<8x2xf32>
    %35 = vector.multi_reduction <add>, %34, %cst_11 [2] : vector<8x2x16xf32> to vector<8x2xf32>
    %36 = vector.shape_cast %35 : vector<8x2xf32> to vector<8x2x1xf32>
    %37 = arith.addf %7, %36 : vector<8x2x1xf32>
    %38 = arith.mulf %17, %25 : vector<8x2x1xf32>
    %39 = vector.broadcast %38 : vector<8x2x1xf32> to vector<8x2x16xf32>
    %40 = arith.mulf %39, %4 : vector<8x2x16xf32>
    %cst_12 = arith.constant dense<0.000000e+00> : vector<2x16xf32>
    %41 = vector.multi_reduction <add>, %40, %cst_12 [0] : vector<8x2x16xf32> to vector<2x16xf32>
    %cst_13 = arith.constant 1.000000e-01 : f32
    %42 = vector.broadcast %cst_13 : f32 to vector<2x16xf32>
    %43 = arith.addf %41, %42 : vector<2x16xf32>
    %44 = vector.shape_cast %43 : vector<2x16xf32> to vector<1x2x16xf32>
    %45 = vector.broadcast %44 : vector<1x2x16xf32> to vector<8x2x16xf32>
    %46 = arith.mulf %4, %45 : vector<8x2x16xf32>
    %cst_14 = arith.constant dense<0.000000e+00> : vector<8x2xf32>
    %47 = vector.multi_reduction <add>, %46, %cst_14 [2] : vector<8x2x16xf32> to vector<8x2xf32>
    %48 = vector.shape_cast %47 : vector<8x2xf32> to vector<8x2x1xf32>
    %49 = arith.addf %8, %48 : vector<8x2x1xf32>
    %50 = arith.mulf %19, %25 : vector<8x2x1xf32>
    %51 = vector.broadcast %50 : vector<8x2x1xf32> to vector<8x2x16xf32>
    %52 = arith.mulf %51, %5 : vector<8x2x16xf32>
    %cst_15 = arith.constant dense<0.000000e+00> : vector<2x16xf32>
    %53 = vector.multi_reduction <add>, %52, %cst_15 [0] : vector<8x2x16xf32> to vector<2x16xf32>
    %cst_16 = arith.constant 1.000000e-01 : f32
    %54 = vector.broadcast %cst_16 : f32 to vector<2x16xf32>
    %55 = arith.addf %53, %54 : vector<2x16xf32>
    %56 = vector.shape_cast %55 : vector<2x16xf32> to vector<1x2x16xf32>
    %57 = vector.broadcast %56 : vector<1x2x16xf32> to vector<8x2x16xf32>
    %58 = arith.mulf %5, %57 : vector<8x2x16xf32>
    %cst_17 = arith.constant dense<0.000000e+00> : vector<8x2xf32>
    %59 = vector.multi_reduction <add>, %58, %cst_17 [2] : vector<8x2x16xf32> to vector<8x2xf32>
    %60 = vector.shape_cast %59 : vector<8x2xf32> to vector<8x2x1xf32>
    %61 = arith.addf %9, %60 : vector<8x2x1xf32>
    %62 = arith.mulf %21, %25 : vector<8x2x1xf32>
    %63 = vector.broadcast %62 : vector<8x2x1xf32> to vector<8x2x16xf32>
    %64 = arith.mulf %63, %6 : vector<8x2x16xf32>
    %cst_18 = arith.constant dense<0.000000e+00> : vector<2x16xf32>
    %65 = vector.multi_reduction <add>, %64, %cst_18 [0] : vector<8x2x16xf32> to vector<2x16xf32>
    %cst_19 = arith.constant 1.000000e-01 : f32
    %66 = vector.broadcast %cst_19 : f32 to vector<2x16xf32>
    %67 = arith.addf %65, %66 : vector<2x16xf32>
    %68 = vector.shape_cast %67 : vector<2x16xf32> to vector<1x2x16xf32>
    %69 = vector.broadcast %68 : vector<1x2x16xf32> to vector<8x2x16xf32>
    %70 = arith.mulf %6, %69 : vector<8x2x16xf32>
    %cst_20 = arith.constant dense<0.000000e+00> : vector<8x2xf32>
    %71 = vector.multi_reduction <add>, %70, %cst_20 [2] : vector<8x2x16xf32> to vector<8x2xf32>
    %72 = vector.shape_cast %71 : vector<8x2xf32> to vector<8x2x1xf32>
    %73 = arith.addf %10, %72 : vector<8x2x1xf32>
    %74 = arith.maximumf %37, %49 : vector<8x2x1xf32>
    %75 = arith.maximumf %74, %61 : vector<8x2x1xf32>
    %76 = arith.maximumf %75, %73 : vector<8x2x1xf32>
    %77 = arith.subf %37, %76 : vector<8x2x1xf32>
    %78 = math.exp %77 : vector<8x2x1xf32>
    %79 = arith.subf %49, %76 : vector<8x2x1xf32>
    %80 = math.exp %79 : vector<8x2x1xf32>
    %81 = arith.subf %61, %76 : vector<8x2x1xf32>
    %82 = math.exp %81 : vector<8x2x1xf32>
    %83 = arith.subf %73, %76 : vector<8x2x1xf32>
    %84 = math.exp %83 : vector<8x2x1xf32>
    %85 = arith.addf %78, %80 : vector<8x2x1xf32>
    %86 = arith.addf %85, %82 : vector<8x2x1xf32>
    %87 = arith.addf %86, %84 : vector<8x2x1xf32>
    %88 = tpu.reciprocal %87 : vector<8x2x1xf32> -> vector<8x2x1xf32>
    %89 = arith.mulf %78, %88 : vector<8x2x1xf32>
    %90 = vector.broadcast %89 : vector<8x2x1xf32> to vector<8x2x16xf32>
    %91 = arith.mulf %90, %3 : vector<8x2x16xf32>
    %cst_21 = arith.constant dense<0.000000e+00> : vector<2x16xf32>
    %92 = vector.multi_reduction <add>, %91, %cst_21 [0] : vector<8x2x16xf32> to vector<2x16xf32>
    %cst_22 = arith.constant 1.000000e-01 : f32
    %93 = vector.broadcast %cst_22 : f32 to vector<2x16xf32>
    %94 = arith.addf %92, %93 : vector<2x16xf32>
    %95 = vector.shape_cast %94 : vector<2x16xf32> to vector<1x2x16xf32>
    %96 = vector.broadcast %95 : vector<1x2x16xf32> to vector<8x2x16xf32>
    %97 = arith.mulf %3, %96 : vector<8x2x16xf32>
    %cst_23 = arith.constant dense<0.000000e+00> : vector<8x2xf32>
    %98 = vector.multi_reduction <add>, %97, %cst_23 [2] : vector<8x2x16xf32> to vector<8x2xf32>
    %99 = vector.shape_cast %98 : vector<8x2xf32> to vector<8x2x1xf32>
    %100 = arith.addf %37, %99 : vector<8x2x1xf32>
    %101 = arith.mulf %80, %88 : vector<8x2x1xf32>
    %102 = vector.broadcast %101 : vector<8x2x1xf32> to vector<8x2x16xf32>
    %103 = arith.mulf %102, %4 : vector<8x2x16xf32>
    %cst_24 = arith.constant dense<0.000000e+00> : vector<2x16xf32>
    %104 = vector.multi_reduction <add>, %103, %cst_24 [0] : vector<8x2x16xf32> to vector<2x16xf32>
    %cst_25 = arith.constant 1.000000e-01 : f32
    %105 = vector.broadcast %cst_25 : f32 to vector<2x16xf32>
    %106 = arith.addf %104, %105 : vector<2x16xf32>
    %107 = vector.shape_cast %106 : vector<2x16xf32> to vector<1x2x16xf32>
    %108 = vector.broadcast %107 : vector<1x2x16xf32> to vector<8x2x16xf32>
    %109 = arith.mulf %4, %108 : vector<8x2x16xf32>
    %cst_26 = arith.constant dense<0.000000e+00> : vector<8x2xf32>
    %110 = vector.multi_reduction <add>, %109, %cst_26 [2] : vector<8x2x16xf32> to vector<8x2xf32>
    %111 = vector.shape_cast %110 : vector<8x2xf32> to vector<8x2x1xf32>
    %112 = arith.addf %49, %111 : vector<8x2x1xf32>
    %113 = arith.mulf %82, %88 : vector<8x2x1xf32>
    %114 = vector.broadcast %113 : vector<8x2x1xf32> to vector<8x2x16xf32>
    %115 = arith.mulf %114, %5 : vector<8x2x16xf32>
    %cst_27 = arith.constant dense<0.000000e+00> : vector<2x16xf32>
    %116 = vector.multi_reduction <add>, %115, %cst_27 [0] : vector<8x2x16xf32> to vector<2x16xf32>
    %cst_28 = arith.constant 1.000000e-01 : f32
    %117 = vector.broadcast %cst_28 : f32 to vector<2x16xf32>
    %118 = arith.addf %116, %117 : vector<2x16xf32>
    %119 = vector.shape_cast %118 : vector<2x16xf32> to vector<1x2x16xf32>
    %120 = vector.broadcast %119 : vector<1x2x16xf32> to vector<8x2x16xf32>
    %121 = arith.mulf %5, %120 : vector<8x2x16xf32>
    %cst_29 = arith.constant dense<0.000000e+00> : vector<8x2xf32>
    %122 = vector.multi_reduction <add>, %121, %cst_29 [2] : vector<8x2x16xf32> to vector<8x2xf32>
    %123 = vector.shape_cast %122 : vector<8x2xf32> to vector<8x2x1xf32>
    %124 = arith.addf %61, %123 : vector<8x2x1xf32>
    %125 = arith.mulf %84, %88 : vector<8x2x1xf32>
    %126 = vector.broadcast %125 : vector<8x2x1xf32> to vector<8x2x16xf32>
    %127 = arith.mulf %126, %6 : vector<8x2x16xf32>
    %cst_30 = arith.constant dense<0.000000e+00> : vector<2x16xf32>
    %128 = vector.multi_reduction <add>, %127, %cst_30 [0] : vector<8x2x16xf32> to vector<2x16xf32>
    %cst_31 = arith.constant 1.000000e-01 : f32
    %129 = vector.broadcast %cst_31 : f32 to vector<2x16xf32>
    %130 = arith.addf %128, %129 : vector<2x16xf32>
    %131 = vector.shape_cast %130 : vector<2x16xf32> to vector<1x2x16xf32>
    %132 = vector.broadcast %131 : vector<1x2x16xf32> to vector<8x2x16xf32>
    %133 = arith.mulf %6, %132 : vector<8x2x16xf32>
    %cst_32 = arith.constant dense<0.000000e+00> : vector<8x2xf32>
    %134 = vector.multi_reduction <add>, %133, %cst_32 [2] : vector<8x2x16xf32> to vector<8x2xf32>
    %135 = vector.shape_cast %134 : vector<8x2xf32> to vector<8x2x1xf32>
    %136 = arith.addf %73, %135 : vector<8x2x1xf32>
    %137 = arith.maximumf %100, %112 : vector<8x2x1xf32>
    %138 = arith.maximumf %137, %124 : vector<8x2x1xf32>
    %139 = arith.maximumf %138, %136 : vector<8x2x1xf32>
    %140 = arith.subf %100, %139 : vector<8x2x1xf32>
    %141 = math.exp %140 : vector<8x2x1xf32>
    %142 = arith.subf %112, %139 : vector<8x2x1xf32>
    %143 = math.exp %142 : vector<8x2x1xf32>
    %144 = arith.subf %124, %139 : vector<8x2x1xf32>
    %145 = math.exp %144 : vector<8x2x1xf32>
    %146 = arith.subf %136, %139 : vector<8x2x1xf32>
    %147 = math.exp %146 : vector<8x2x1xf32>
    %148 = arith.addf %141, %143 : vector<8x2x1xf32>
    %149 = arith.addf %148, %145 : vector<8x2x1xf32>
    %150 = arith.addf %149, %147 : vector<8x2x1xf32>
    %151 = tpu.reciprocal %150 : vector<8x2x1xf32> -> vector<8x2x1xf32>
    %152 = arith.mulf %141, %151 : vector<8x2x1xf32>
    %153 = vector.broadcast %152 : vector<8x2x1xf32> to vector<8x2x16xf32>
    %154 = arith.mulf %153, %3 : vector<8x2x16xf32>
    %cst_33 = arith.constant dense<0.000000e+00> : vector<2x16xf32>
    %155 = vector.multi_reduction <add>, %154, %cst_33 [0] : vector<8x2x16xf32> to vector<2x16xf32>
    %cst_34 = arith.constant 1.000000e-01 : f32
    %156 = vector.broadcast %cst_34 : f32 to vector<2x16xf32>
    %157 = arith.addf %155, %156 : vector<2x16xf32>
    %158 = arith.mulf %157, %157 : vector<2x16xf32>
    %cst_35 = arith.constant dense<0.000000e+00> : vector<2xf32>
    %159 = vector.multi_reduction <add>, %158, %cst_35 [1] : vector<2x16xf32> to vector<2xf32>
    %160 = vector.shape_cast %159 : vector<2xf32> to vector<2x1xf32>
    %161 = math.sqrt %160 : vector<2x1xf32>
    %cst_36 = arith.constant 1.000000e+00 : f32
    %162 = vector.broadcast %cst_36 : f32 to vector<2x1xf32>
    %163 = arith.addf %162, %160 : vector<2x1xf32>
    %164 = tpu.reciprocal %163 : vector<2x1xf32> -> vector<2x1xf32>
    %165 = arith.mulf %161, %164 : vector<2x1xf32>
    %166 = vector.broadcast %165 : vector<2x1xf32> to vector<2x16xf32>
    %167 = arith.mulf %157, %166 : vector<2x16xf32>
    %c0_37 = arith.constant 0 : index
    %c0_38 = arith.constant 0 : index
    %c0_39 = arith.constant 0 : index
    %168 = vector.load %arg2[%c0_37, %c0_38, %c0_39] : memref<4x2x16xf32, #tpu.memory_space<vmem>>, vector<1x2x16xf32>
    %169 = vector.shape_cast %168 : vector<1x2x16xf32> to vector<2x16xf32>
    %170 = vector.shape_cast %167 : vector<2x16xf32> to vector<1x2x16xf32>
    tpu.vector_store %arg2[%c0_37, %c0_38, %c0_39], %170 {strides = array<i32>} : memref<4x2x16xf32, #tpu.memory_space<vmem>>, vector<1x2x16xf32>,
    %171 = arith.mulf %143, %151 : vector<8x2x1xf32>
    %172 = vector.broadcast %171 : vector<8x2x1xf32> to vector<8x2x16xf32>
    %173 = arith.mulf %172, %4 : vector<8x2x16xf32>
    %cst_40 = arith.constant dense<0.000000e+00> : vector<2x16xf32>
    %174 = vector.multi_reduction <add>, %173, %cst_40 [0] : vector<8x2x16xf32> to vector<2x16xf32>
    %cst_41 = arith.constant 1.000000e-01 : f32
    %175 = vector.broadcast %cst_41 : f32 to vector<2x16xf32>
    %176 = arith.addf %174, %175 : vector<2x16xf32>
    %177 = arith.mulf %176, %176 : vector<2x16xf32>
    %cst_42 = arith.constant dense<0.000000e+00> : vector<2xf32>
    %178 = vector.multi_reduction <add>, %177, %cst_42 [1] : vector<2x16xf32> to vector<2xf32>
    %179 = vector.shape_cast %178 : vector<2xf32> to vector<2x1xf32>
    %180 = math.sqrt %179 : vector<2x1xf32>
    %cst_43 = arith.constant 1.000000e+00 : f32
    %181 = vector.broadcast %cst_43 : f32 to vector<2x1xf32>
    %182 = arith.addf %181, %179 : vector<2x1xf32>
    %183 = tpu.reciprocal %182 : vector<2x1xf32> -> vector<2x1xf32>
    %184 = arith.mulf %180, %183 : vector<2x1xf32>
    %185 = vector.broadcast %184 : vector<2x1xf32> to vector<2x16xf32>
    %186 = arith.mulf %176, %185 : vector<2x16xf32>
    %c1 = arith.constant 1 : index
    %c0_44 = arith.constant 0 : index
    %c0_45 = arith.constant 0 : index
    %187 = vector.load %arg2[%c1, %c0_44, %c0_45] : memref<4x2x16xf32, #tpu.memory_space<vmem>>, vector<1x2x16xf32>
    %188 = vector.shape_cast %187 : vector<1x2x16xf32> to vector<2x16xf32>
    %189 = vector.shape_cast %186 : vector<2x16xf32> to vector<1x2x16xf32>
    tpu.vector_store %arg2[%c1, %c0_44, %c0_45], %189 {strides = array<i32>} : memref<4x2x16xf32, #tpu.memory_space<vmem>>, vector<1x2x16xf32>,
    %190 = arith.mulf %145, %151 : vector<8x2x1xf32>
    %191 = vector.broadcast %190 : vector<8x2x1xf32> to vector<8x2x16xf32>
    %192 = arith.mulf %191, %5 : vector<8x2x16xf32>
    %cst_46 = arith.constant dense<0.000000e+00> : vector<2x16xf32>
    %193 = vector.multi_reduction <add>, %192, %cst_46 [0] : vector<8x2x16xf32> to vector<2x16xf32>
    %cst_47 = arith.constant 1.000000e-01 : f32
    %194 = vector.broadcast %cst_47 : f32 to vector<2x16xf32>
    %195 = arith.addf %193, %194 : vector<2x16xf32>
    %196 = arith.mulf %195, %195 : vector<2x16xf32>
    %cst_48 = arith.constant dense<0.000000e+00> : vector<2xf32>
    %197 = vector.multi_reduction <add>, %196, %cst_48 [1] : vector<2x16xf32> to vector<2xf32>
    %198 = vector.shape_cast %197 : vector<2xf32> to vector<2x1xf32>
    %199 = math.sqrt %198 : vector<2x1xf32>
    %cst_49 = arith.constant 1.000000e+00 : f32
    %200 = vector.broadcast %cst_49 : f32 to vector<2x1xf32>
    %201 = arith.addf %200, %198 : vector<2x1xf32>
    %202 = tpu.reciprocal %201 : vector<2x1xf32> -> vector<2x1xf32>
    %203 = arith.mulf %199, %202 : vector<2x1xf32>
    %204 = vector.broadcast %203 : vector<2x1xf32> to vector<2x16xf32>
    %205 = arith.mulf %195, %204 : vector<2x16xf32>
    %c2 = arith.constant 2 : index
    %c0_50 = arith.constant 0 : index
    %c0_51 = arith.constant 0 : index
    %206 = vector.load %arg2[%c2, %c0_50, %c0_51] : memref<4x2x16xf32, #tpu.memory_space<vmem>>, vector<1x2x16xf32>
    %207 = vector.shape_cast %206 : vector<1x2x16xf32> to vector<2x16xf32>
    %208 = vector.shape_cast %205 : vector<2x16xf32> to vector<1x2x16xf32>
    tpu.vector_store %arg2[%c2, %c0_50, %c0_51], %208 {strides = array<i32>} : memref<4x2x16xf32, #tpu.memory_space<vmem>>, vector<1x2x16xf32>,
    %209 = arith.mulf %147, %151 : vector<8x2x1xf32>
    %210 = vector.broadcast %209 : vector<8x2x1xf32> to vector<8x2x16xf32>
    %211 = arith.mulf %210, %6 : vector<8x2x16xf32>
    %cst_52 = arith.constant dense<0.000000e+00> : vector<2x16xf32>
    %212 = vector.multi_reduction <add>, %211, %cst_52 [0] : vector<8x2x16xf32> to vector<2x16xf32>
    %cst_53 = arith.constant 1.000000e-01 : f32
    %213 = vector.broadcast %cst_53 : f32 to vector<2x16xf32>
    %214 = arith.addf %212, %213 : vector<2x16xf32>
    %215 = arith.mulf %214, %214 : vector<2x16xf32>
    %cst_54 = arith.constant dense<0.000000e+00> : vector<2xf32>
    %216 = vector.multi_reduction <add>, %215, %cst_54 [1] : vector<2x16xf32> to vector<2xf32>
    %217 = vector.shape_cast %216 : vector<2xf32> to vector<2x1xf32>
    %218 = math.sqrt %217 : vector<2x1xf32>
    %cst_55 = arith.constant 1.000000e+00 : f32
    %219 = vector.broadcast %cst_55 : f32 to vector<2x1xf32>
    %220 = arith.addf %219, %217 : vector<2x1xf32>
    %221 = tpu.reciprocal %220 : vector<2x1xf32> -> vector<2x1xf32>
    %222 = arith.mulf %218, %221 : vector<2x1xf32>
    %223 = vector.broadcast %222 : vector<2x1xf32> to vector<2x16xf32>
    %224 = arith.mulf %214, %223 : vector<2x16xf32>
    %c3 = arith.constant 3 : index
    %c0_56 = arith.constant 0 : index
    %c0_57 = arith.constant 0 : index
    %225 = vector.load %arg2[%c3, %c0_56, %c0_57] : memref<4x2x16xf32, #tpu.memory_space<vmem>>, vector<1x2x16xf32>
    %226 = vector.shape_cast %225 : vector<1x2x16xf32> to vector<2x16xf32>
    %227 = vector.shape_cast %224 : vector<2x16xf32> to vector<1x2x16xf32>
    tpu.vector_store %arg2[%c3, %c0_56, %c0_57], %227 {strides = array<i32>} : memref<4x2x16xf32, #tpu.memory_space<vmem>>, vector<1x2x16xf32>,
    return
  }
}

</mosaic_0001>

<bundles_post_ra>
// kernel: tpu_custom_call.1
= control target key start
LH: loop header
LB: loop body
LE: loop exit
PB: predicated region body
PF: predicated region fallthrough
CT: control target
= control target key end

     0   :  { %7 = vsyncpa [#allocation3], 0  ;;  %s3133_s0 = inlined_call_operand.hbm [shape: f32[8,2,8], index: 0, kind: input, shape index: {}]   ;;  %s3134_s1 = inlined_call_operand.hbm [shape: f32[8,8,64], index: 1, kind: input, shape index: {}]   ;;  %s3135_s2 = inlined_call_operand.hbm [shape: f32[4,2,16], index: 2, kind: output, shape index: {}]  }
   0x1   :  { %8 = vsyncpa [#allocation6], 0 }
   0x2   :  { %9 = vsyncpa [#allocation4], 0  ;;  %s2223_s9 = smov [#allocation2]   ;;  %s2151_s13 = scalar_lea.hbm %s3133_s0, 256 }
   0x3   :  { %s15_s10 = sshll.u32 %s2223_s9, 4  ;;  %p2152_p0 = scmp.ne.s32.totalorder %s3133_s0, %s2151_s13  ;;  %s16_s10 = int_to_ptr.vmem [resolvable:$true] %s15_s10 }
   0x4   :  { %p2155_p1 = scmp.lt.u32.totalorder %s2151_s13, %s3133_s0 }
   0x6   :  { %p2157_p2 = pnand %p2155_p1, %p2152_p0 }
   0x8   :  { %2160 = shalt.err (!%p2157_p2)
}
   0x9   :  { %s2161_s18 = scalar_lea.vmem %s16_s10, 256  ;;  %p2166_p4 = scmp.lt.s32.totalorder %s16_s10, %s16_s10 }
   0xa   :  { %p2162_p3 = scmp.ne.s32.totalorder %s16_s10, %s2161_s18  ;;  %p2167_p5 = scmp.lt.s32.totalorder %s2161_s18, %s2161_s18 }
   0xc   :  { %p2168_p6 = por %p2167_p5, %p2166_p4 }
   0xe   :  { %p2169_p7 = pnand %p2168_p6, %p2162_p3 }
  0x10   :  { %2172 = shalt.err (!%p2169_p7)
}
  0x11   :  { %s2224_s19 = smov 32   ;;  %s2225_s20 = smov 2  }
  0x12   :  { %21 = dma.hbm_to_vmem [thread:$0]  %s3133_s0, 256, %s16_s10, [#allocation3], %s2224_s19, %s2224_s19, %s2225_s20  }
  0x13   :  { %s2226_s23 = smov [#allocation5]   ;;  %s2173_s27 = scalar_lea.hbm %s3134_s1, 1024 }
  0x14   :  { %s27_s24 = sshll.u32 %s2226_s23, 4  ;;  %p2174_p8 = scmp.ne.s32.totalorder %s3134_s1, %s2173_s27  ;;  %s28_s24 = int_to_ptr.vmem [resolvable:$true] %s27_s24 }
  0x15   :  { %p2177_p9 = scmp.lt.u32.totalorder %s2173_s27, %s3134_s1 }
  0x17   :  { %p2179_p10 = pnand %p2177_p9, %p2174_p8 }
  0x19   :  { %2182 = shalt.err (!%p2179_p10)
}
  0x1a   :  { %s2183_s4 = scalar_lea.vmem %s28_s24, 1024  ;;  %p2188_p12 = scmp.lt.s32.totalorder %s28_s24, %s28_s24 }
  0x1b   :  { %p2184_p11 = scmp.ne.s32.totalorder %s28_s24, %s2183_s4  ;;  %p2189_p13 = scmp.lt.s32.totalorder %s2183_s4, %s2183_s4 }
  0x1d   :  { %p2190_p0 = por %p2189_p13, %p2188_p12 }
  0x1f   :  { %p2191_p1 = pnand %p2190_p0, %p2184_p11 }
  0x21   :  { %2194 = shalt.err (!%p2191_p1)
}
  0x22   :  { %s2227_s0 = smov 128   ;;  %s2228_s5 = smov 8  }
  0x23   :  { %33 = dma.hbm_to_vmem [thread:$0]  %s3134_s1, 1024, %s28_s24, [#allocation6], %s2227_s0, %s2227_s0, %s2228_s5  }
  0x24   :  { %2217 = dma.done.wait [#allocation3], 256  }
  0x25   :  { %2218 = vsyncadd [#allocation3], 4294967040 }
  0x26   :  { %2219 = dma.done.wait [#allocation6], 1024  }
  0x27   :  { %2220 = vsyncadd [#allocation6], 4294966272  ;;  %v2229_v0 = vmov 0.0   ;;  %vm2230_vm0 = vmmov 0   ;;  %vm56_vm1 = vcmask 64512   ;;  %v48_v1 = vld [vmem:[#allocation5] sm:$0xff] }
  0x28   :  { %1923 = vmatprep.subr.mxu0 %v2229_v0  ;;  %1925 = vmatprep.mubr.msk.f32.mxu0 %vm2230_vm0, %v2229_v0  ;;  %v40_v2 = vld [vmem:[#allocation2] sm:$0x3]  ;;  %v49_v3 = vld [vmem:[#allocation5 + $0x8] sm:$0xff]  ;;  %v41_v4 = vld [vmem:[#allocation2 + $0x2] sm:$0x3]  ;;  %vm707_vm2 = vcmask 255104  }
  0x29   :  { %1928 = vmatprep.subr.mxu1 %v2229_v0  ;;  %1930 = vmatprep.mubr.msk.f32.mxu1 %vm2230_vm0, %v2229_v0  ;;  %v50_v5 = vld [vmem:[#allocation5 + $0x10] sm:$0xff]  ;;  %v51_v6 = vld [vmem:[#allocation5 + $0x18] sm:$0xff]  ;;  %v52_v8 = vld [vmem:[#allocation5 + $0x20] sm:$0xff]  ;;  %vm796_vm3 = vcmask 386304   ;;  %vm885_vm4 = vcmask 517504   ;;  %vm650_vm5 = vcmask 123904  }
  0x2a   :  { %1924 = vmatpush3.msra.mxu0 %v48_v1  ;;  %1929 = vmatpush3.msra.mxu1 %v49_v3  ;;  %v42_v7 = vld [vmem:[#allocation2 + $0x4] sm:$0x3]  ;;  %v43_v9 = vld [vmem:[#allocation2 + $0x6] sm:$0x3]  ;;  %v53_v10 = vld [vmem:[#allocation5 + $0x28] sm:$0xff]  ;;  %s2231_s1 = smov 112  }
  0x2b   :  { %1926 = vmatmul.mubr.msk.f32.vlgmr.msra.gmra.mrb[0].mxu0 %vm56_vm1, %v40_v2  ;;  %1933 = vmatprep.subr.mxu0 %v2229_v0  ;;  %v44_v11 = vld [vmem:[#allocation2 + $0x8] sm:$0x3]  ;;  %v54_v12 = vld [vmem:[#allocation5 + $0x30] sm:$0xff]  ;;  %v45_v13 = vld [vmem:[#allocation2 + $0xa] sm:$0x3]  ;;  %s2232_s8 = smov 96  }
  0x2c   :  { %1931 = vmatmul.mubr.msk.f32.vlgmr.msra.gmra.mrb[0].mxu1 %vm56_vm1, %v41_v4  ;;  %1934 = vmatpush3.msra.mxu0 %v50_v5  ;;  %v55_v14 = vld [vmem:[#allocation5 + $0x38] sm:$0xff]  ;;  %s2233_s9 = smov 80   ;;  %s2234_s10 = smov [#allocation7]  }
  0x2d   :  { %1938 = vmatprep.subr.mxu1 %v2229_v0  ;;  %1935 = vmatprep.mubr.msk.f32.mxu0 %vm2230_vm0, %v2229_v0  ;;  %v46_v15 = vld [vmem:[#allocation2 + $0xc] sm:$0x3]  ;;  %v47_v16 = vld [vmem:[#allocation2 + $0xe] sm:$0x3]  ;;  %s1886_s11 = sshll.u32 %s2234_s10, 4  ;;  %s1887_s11 = int_to_ptr.vmem [resolvable:$true] %s1886_s11 }
  0x2e   :  { %1939 = vmatpush3.msra.mxu1 %v51_v6  ;;  %1943 = vmatprep.subr.mxu0 %v2229_v0  ;;  %s2195_s12 = scalar_lea.vmem %s1887_s11, 128  ;;  %p2200_p3 = scmp.lt.s32.totalorder %s1887_s11, %s1887_s11 }
  0x2f   :  { %1936 = vmatmul.mubr.msk.f32.vlgmr.msra.gmra.mrb[2].mxu0 %vm56_vm1, %v42_v7  ;;  %1940 = vmatprep.mubr.msk.f32.mxu1 %vm2230_vm0, %v2229_v0  ;;  %p2196_p2 = scmp.ne.s32.totalorder %s1887_s11, %s2195_s12  ;;  %p2201_p4 = scmp.lt.s32.totalorder %s2195_s12, %s2195_s12 }
  0x30   :  { %1944 = vmatpush3.msra.mxu0 %v52_v8  ;;  %1941 = vmatmul.mubr.msk.f32.vlgmr.msra.gmra.mrb[2].mxu1 %vm56_vm1, %v43_v9 }
  0x31   :  { %1948 = vmatprep.subr.mxu1 %v2229_v0  ;;  %1945 = vmatprep.mubr.msk.f32.mxu0 %vm2230_vm0, %v2229_v0  ;;  %p2202_p5 = por %p2201_p4, %p2200_p3 }
  0x32   :  { %1949 = vmatpush3.msra.mxu1 %v53_v10  ;;  %1953 = vmatprep.subr.mxu0 %v2229_v0 }
  0x33   :  { %1946 = vmatmul.mubr.msk.f32.vlgmr.msra.gmra.mrb[4].mxu0 %vm56_vm1, %v44_v11  ;;  %1950 = vmatprep.mubr.msk.f32.mxu1 %vm2230_vm0, %v2229_v0  ;;  %p2203_p6 = pnand %p2202_p5, %p2196_p2 }
  0x34   :  { %1954 = vmatpush3.msra.mxu0 %v54_v12  ;;  %1951 = vmatmul.mubr.msk.f32.vlgmr.msra.gmra.mrb[4].mxu1 %vm56_vm1, %v45_v13 }
  0x35   :  { %1958 = vmatprep.subr.mxu1 %v2229_v0  ;;  %1955 = vmatprep.mubr.msk.f32.mxu0 %vm2230_vm0, %v2229_v0 }
  0x36   :  { %1959 = vmatpush3.msra.mxu1 %v55_v14  ;;  %1960 = vmatprep.mubr.msk.f32.mxu1 %vm2230_vm0, %v2229_v0 }
  0x37   :  { %1956 = vmatmul.mubr.msk.f32.vlgmr.msra.gmra.mrb[6].mxu0 %vm56_vm1, %v46_v15 }
  0x38   :  { %1961 = vmatmul.mubr.msk.f32.vlgmr.msra.gmra.mrb[6].mxu1 %vm56_vm1, %v47_v16 }
  0xfe   :  { %v2293_v17 = vpop.f32.mrb[0].mxu0 }
  0xff   :  { %v1927_v18 = vpop.f32.mrb[1].mxu0  ;;  %v2295_v19 = vpop.f32.mrb[0].mxu1  ;;  %v642_v20 = vmul.f32 0.25, %v2293_v17 }
 0x100   :  { %v1932_v21 = vpop.f32.mrb[1].mxu1  ;;  %v643_v22 = vmul.f32 0.25, %v2295_v19 }
 0x101   :  { %v708_v23 = vsel %vm707_vm2, %v642_v20, 0.0  ;;  %v797_v24 = vsel %vm796_vm3, %v642_v20, 0.0  ;;  %v886_v25 = vsel %vm885_vm4, %v642_v20, 0.0  ;;  %v651_v26 = vsel %vm650_vm5, %v642_v20, 0.0 }
 0x102   :  { %v2303_v27 = vpop.f32.mrb[2].mxu0  ;;  %v709_v28 = vsel %vm707_vm2, %v643_v22, 0.0  ;;  %v798_v29 = vsel %vm796_vm3, %v643_v22, 0.0  ;;  %v887_v30 = vsel %vm885_vm4, %v643_v22, 0.0  ;;  %v652_v31 = vsel %vm650_vm5, %v643_v22, 0.0 }
 0x103   :  { %v1937_v32 = vpop.f32.mrb[3].mxu0  ;;  %v2309_v33 = vpop.f32.mrb[2].mxu1  ;;  %v644_v34 = vmul.f32 0.25, %v2303_v27  ;;  %v710_v35 = vadd.f32 %v709_v28, %v708_v23  ;;  %v799_v36 = vadd.f32 %v798_v29, %v797_v24  ;;  %v888_v37 = vadd.f32 %v887_v30, %v886_v25 }
 0x104   :  { %v1942_v38 = vpop.f32.mrb[3].mxu1  ;;  %v645_v39 = vmul.f32 0.25, %v2309_v33  ;;  %v653_v40 = vadd.f32 %v652_v31, %v651_v26 }
 0x105   :  { %v711_v41 = vsel %vm707_vm2, %v644_v34, 0.0  ;;  %v800_v42 = vsel %vm796_vm3, %v644_v34, 0.0  ;;  %v889_v43 = vsel %vm885_vm4, %v644_v34, 0.0  ;;  %v654_v44 = vsel %vm650_vm5, %v644_v34, 0.0 }
 0x106   :  { %v2317_v45 = vpop.f32.mrb[4].mxu0  ;;  %v712_v46 = vadd.f32 %v711_v41, %v710_v35  ;;  %v713_v47 = vsel %vm707_vm2, %v645_v39, 0.0  ;;  %v801_v48 = vadd.f32 %v800_v42, %v799_v36  ;;  %v802_v49 = vsel %vm796_vm3, %v645_v39, 0.0 }
 0x107   :  { %v1947_v50 = vpop.f32.mrb[5].mxu0  ;;  %v2321_v51 = vpop.f32.mrb[4].mxu1  ;;  %v646_v52 = vmul.f32 0.25, %v2317_v45  ;;  %v890_v53 = vadd.f32 %v889_v43, %v888_v37  ;;  %v891_v54 = vsel %vm885_vm4, %v645_v39, 0.0  ;;  %v655_v55 = vadd.f32 %v654_v44, %v653_v40 }
 0x108   :  { %v1952_v56 = vpop.f32.mrb[5].mxu1  ;;  %v647_v57 = vmul.f32 0.25, %v2321_v51  ;;  %v714_v58 = vadd.f32 %v713_v47, %v712_v46  ;;  %v803_v59 = vadd.f32 %v802_v49, %v801_v48  ;;  %v656_v60 = vsel %vm650_vm5, %v645_v39, 0.0 }
 0x109   :  { %v715_v61 = vsel %vm707_vm2, %v646_v52, 0.0  ;;  %v804_v62 = vsel %vm796_vm3, %v646_v52, 0.0  ;;  %v892_v63 = vadd.f32 %v891_v54, %v890_v53  ;;  %v893_v0 = vsel %vm885_vm4, %v646_v52, 0.0 }
 0x10a   :  { %v2330_v1 = vpop.f32.mrb[6].mxu0  ;;  %v716_v2 = vadd.f32 %v715_v61, %v714_v58  ;;  %v717_v3 = vsel %vm707_vm2, %v647_v57, 0.0  ;;  %v805_v4 = vadd.f32 %v804_v62, %v803_v59  ;;  %v806_v5 = vsel %vm796_vm3, %v647_v57, 0.0 }
 0x10b   :  { %v1957_v6 = vpop.f32.mrb[7].mxu0  ;;  %v2334_v7 = vpop.f32.mrb[6].mxu1  ;;  %v648_v8 = vmul.f32 0.25, %v2330_v1  ;;  %v894_v9 = vadd.f32 %v893_v0, %v892_v63  ;;  %v895_v10 = vsel %vm885_vm4, %v647_v57, 0.0  ;;  %v657_v11 = vadd.f32 %v656_v60, %v655_v55 }
 0x10c   :  { %v1962_v12 = vpop.f32.mrb[7].mxu1  ;;  %v649_v13 = vmul.f32 0.25, %v2334_v7  ;;  %v718_v14 = vadd.f32 %v717_v3, %v716_v2  ;;  %v807_v15 = vadd.f32 %v806_v5, %v805_v4  ;;  %v658_v16 = vsel %vm650_vm5, %v646_v52, 0.0 }
 0x10d   :  { %v719_v18 = vsel %vm707_vm2, %v648_v8, 0.0  ;;  %v808_v20 = vsel %vm796_vm3, %v648_v8, 0.0  ;;  %v896_v21 = vadd.f32 %v895_v10, %v894_v9  ;;  %v897_v22 = vsel %vm885_vm4, %v648_v8, 0.0 }
 0x10e   :  { %v720_v23 = vadd.f32 %v719_v18, %v718_v14  ;;  %v721_v24 = vsel %vm707_vm2, %v649_v13, 0.0  ;;  %v809_v25 = vadd.f32 %v808_v20, %v807_v15  ;;  %v810_v26 = vsel %vm796_vm3, %v649_v13, 0.0 }
 0x10f   :  { %v898_v28 = vadd.f32 %v897_v22, %v896_v21  ;;  %v899_v29 = vsel %vm885_vm4, %v649_v13, 0.0  ;;  %v659_v30 = vadd.f32 %v658_v16, %v657_v11  ;;  %v660_v31 = vsel %vm650_vm5, %v647_v57, 0.0 }
 0x110   :  { %v722_v32 = vadd.f32 %v721_v24, %v720_v23  ;;  %v811_v34 = vadd.f32 %v810_v26, %v809_v25  ;;  %v662_v35 = vsel %vm650_vm5, %v648_v8, 0.0  ;;  %v664_v55 = vsel %vm650_vm5, %v649_v13, 0.0 }
 0x111   :  { %v900_v36 = vadd.f32 %v899_v29, %v898_v28  ;;  %v661_v37 = vadd.f32 %v660_v31, %v659_v30 }
 0x112   :  { %v723_v38 = vadd.f32 0.1, %v722_v32  ;;  %v812_v39 = vadd.f32 0.1, %v811_v34 }
 0x113   :  { %v901_v40 = vadd.f32 0.1, %v900_v36  ;;  %v663_v41 = vadd.f32 %v662_v35, %v661_v37 }
 0x114   :  { %v726_v42 = vmul.f32 %v723_v38, %v2303_v27  ;;  %v724_v43 = vmul.f32 %v723_v38, %v2293_v17  ;;  %v813_v44 = vmul.f32 %v812_v39, %v2293_v17  ;;  %v725_v46 = vmul.f32 %v723_v38, %v2295_v19 }
 0x115   :  { %v727_v47 = vmul.f32 %v723_v38, %v2309_v33  ;;  %v814_v48 = vmul.f32 %v812_v39, %v2295_v19  ;;  %v902_v49 = vmul.f32 %v901_v40, %v2293_v17  ;;  %v815_v50 = vmul.f32 %v812_v39, %v2303_v27 }
 0x116   :  { %744 = vrot.lane.b32.xlu1 %v726_v42, %s2231_s1  ;;  %740 = vrot.lane.b32.xlu0 %v724_v43, %s2231_s1  ;;  %v728_v52 = vmul.f32 %v723_v38, %v2317_v45  ;;  %v903_v53 = vmul.f32 %v901_v40, %v2295_v19  ;;  %v904_v54 = vmul.f32 %v901_v40, %v2303_v27 }
 0x117   :  { %v816_v56 = vmul.f32 %v812_v39, %v2309_v33  ;;  %v817_v57 = vmul.f32 %v812_v39, %v2317_v45  ;;  %v729_v58 = vmul.f32 %v723_v38, %v2321_v51  ;;  %v730_v59 = vmul.f32 %v723_v38, %v2330_v1 }
 0x118   :  { %v905_v60 = vmul.f32 %v901_v40, %v2309_v33  ;;  %v906_v61 = vmul.f32 %v901_v40, %v2317_v45  ;;  %v818_v62 = vmul.f32 %v812_v39, %v2321_v51  ;;  %v819_v63 = vmul.f32 %v812_v39, %v2330_v1 }
 0x119   :  { %v731_v0 = vmul.f32 %v723_v38, %v2334_v7  ;;  %v820_v2 = vmul.f32 %v812_v39, %v2334_v7  ;;  %v907_v3 = vmul.f32 %v901_v40, %v2321_v51  ;;  %v909_v4 = vmul.f32 %v901_v40, %v2334_v7 }
 0x11a   :  { %829 = vrot.lane.b32.xlu1 %v813_v44, %s2232_s8  ;;  %742 = vrot.lane.b32.xlu0 %v725_v46, %s2231_s1  ;;  %v908_v5 = vmul.f32 %v901_v40, %v2330_v1  ;;  %v665_v6 = vadd.f32 %v664_v55, %v663_v41 }
 0x11c   :  { %v666_v8 = vadd.f32 0.1, %v665_v6 }
 0x11e   :  { %746 = vrot.lane.b32.xlu1 %v727_v47, %s2231_s1  ;;  %831 = vrot.lane.b32.xlu0 %v814_v48, %s2232_s8  ;;  %v667_v9 = vmul.f32 %v666_v8, %v2293_v17  ;;  %v671_v10 = vmul.f32 %v666_v8, %v2317_v45  ;;  %v668_v11 = vmul.f32 %v666_v8, %v2295_v19 }
 0x11f   :  { %v672_v12 = vmul.f32 %v666_v8, %v2321_v51  ;;  %v669_v13 = vmul.f32 %v666_v8, %v2303_v27  ;;  %v673_v14 = vmul.f32 %v666_v8, %v2330_v1  ;;  %v670_v15 = vmul.f32 %v666_v8, %v2309_v33 }
 0x120   :  { %v674_v16 = vmul.f32 %v666_v8, %v2334_v7  ;;  %v675_v18 = vsel %vm650_vm5, %v667_v9, 0.0  ;;  %v687_v20 = vsel %vm650_vm5, %v671_v10, 0.0  ;;  %v678_v21 = vsel %vm650_vm5, %v668_v11, 0.0 }
 0x121   :  { %v690_v22 = vsel %vm650_vm5, %v672_v12, 0.0  ;;  %v681_v23 = vsel %vm650_vm5, %v669_v13, 0.0  ;;  %v693_v24 = vsel %vm650_vm5, %v673_v14, 0.0  ;;  %v684_v25 = vsel %vm650_vm5, %v670_v15, 0.0 }
 0x122   :  { %918 = vrot.lane.b32.xlu1 %v902_v49, %s2233_s9  ;;  %833 = vrot.lane.b32.xlu0 %v815_v50, %s2232_s8  ;;  %v696_v26 = vsel %vm650_vm5, %v674_v16, 0.0 }
 0x126   :  { %748 = vrot.lane.b32.xlu1 %v728_v52, %s2231_s1  ;;  %920 = vrot.lane.b32.xlu0 %v903_v53, %s2233_s9 }
 0x12a   :  { %922 = vrot.lane.b32.xlu1 %v904_v54, %s2233_s9  ;;  %835 = vrot.lane.b32.xlu0 %v816_v56, %s2232_s8 }
 0x12e   :  { %837 = vrot.lane.b32.xlu1 %v817_v57, %s2232_s8  ;;  %750 = vrot.lane.b32.xlu0 %v729_v58, %s2231_s1 }
 0x132   :  { %752 = vrot.lane.b32.xlu1 %v730_v59, %s2231_s1  ;;  %924 = vrot.lane.b32.xlu0 %v905_v60, %s2233_s9 }
 0x136   :  { %926 = vrot.lane.b32.xlu1 %v906_v61, %s2233_s9  ;;  %839 = vrot.lane.b32.xlu0 %v818_v62, %s2232_s8 }
 0x13a   :  { %841 = vrot.lane.b32.xlu1 %v819_v63, %s2232_s8  ;;  %754 = vrot.lane.b32.xlu0 %v731_v0, %s2231_s1 }
 0x13e   :  { %843 = vrot.lane.b32.xlu1 %v820_v2, %s2232_s8  ;;  %928 = vrot.lane.b32.xlu0 %v907_v3, %s2233_s9 }
 0x142   :  { %932 = vrot.lane.b32.xlu1 %v909_v4, %s2233_s9  ;;  %930 = vrot.lane.b32.xlu0 %v908_v5, %s2233_s9 }
 0x161   :  { %676 = vadd.xlane.f32.xlu0 %v675_v18 }
 0x165   :  { %688 = vadd.xlane.f32.xlu0 %v687_v20 }
 0x166   :  { %679 = vadd.xlane.f32.xlu1 %v678_v21 }
 0x169   :  { %691 = vadd.xlane.f32.xlu0 %v690_v22 }
 0x16a   :  { %682 = vadd.xlane.f32.xlu1 %v681_v23 }
 0x16d   :  { %694 = vadd.xlane.f32.xlu0 %v693_v24 }
 0x16e   :  { %685 = vadd.xlane.f32.xlu1 %v684_v25 }
 0x171   :  { %697 = vadd.xlane.f32.xlu0 %v696_v26 }
 0x188   :  { %v745_v28 = vpop.permute.xlu1 %744  ;;  %v741_v29 = vpop.permute.xlu0 %740 }
 0x189   :  { %v764_v30 = vsel %vm650_vm5, %v741_v29, 0.0  ;;  %v770_v38 = vsel %vm650_vm5, %v745_v28, 0.0 }
 0x18a   :  { %765 = vadd.xlane.f32.xlu0 %v764_v30 }
 0x18c   :  { %v830_v31 = vpop.permute.xlu1 %829  ;;  %v743_v32 = vpop.permute.xlu0 %742 }
 0x18d   :  { %v853_v34 = vsel %vm650_vm5, %v830_v31, 0.0  ;;  %v767_v35 = vsel %vm650_vm5, %v743_v32, 0.0 }
 0x18e   :  { %854 = vadd.xlane.f32.xlu1 %v853_v34  ;;  %768 = vadd.xlane.f32.xlu0 %v767_v35 }
 0x190   :  { %v747_v36 = vpop.permute.xlu1 %746  ;;  %v832_v37 = vpop.permute.xlu0 %831 }
 0x191   :  { %v856_v42 = vsel %vm650_vm5, %v832_v37, 0.0  ;;  %v773_v47 = vsel %vm650_vm5, %v747_v36, 0.0 }
 0x192   :  { %771 = vadd.xlane.f32.xlu0 %v770_v38 }
 0x194   :  { %v919_v39 = vpop.permute.xlu1 %918  ;;  %v834_v40 = vpop.permute.xlu0 %833 }
 0x195   :  { %v859_v41 = vsel %vm650_vm5, %v834_v40, 0.0  ;;  %v942_v52 = vsel %vm650_vm5, %v919_v39, 0.0 }
 0x196   :  { %860 = vadd.xlane.f32.xlu1 %v859_v41  ;;  %857 = vadd.xlane.f32.xlu0 %v856_v42 }
 0x198   :  { %v749_v43 = vpop.permute.xlu1 %748  ;;  %v921_v44 = vpop.permute.xlu0 %920 }
 0x199   :  { %v945_v46 = vsel %vm650_vm5, %v921_v44, 0.0  ;;  %v776_v50 = vsel %vm650_vm5, %v749_v43, 0.0 }
 0x19a   :  { %946 = vadd.xlane.f32.xlu1 %v945_v46  ;;  %774 = vadd.xlane.f32.xlu0 %v773_v47 }
 0x19c   :  { %v923_v48 = vpop.permute.xlu1 %922  ;;  %v836_v49 = vpop.permute.xlu0 %835 }
 0x19d   :  { %v948_v55 = vsel %vm650_vm5, %v923_v48, 0.0  ;;  %v862_v56 = vsel %vm650_vm5, %v836_v49, 0.0 }
 0x19e   :  { %777 = vadd.xlane.f32.xlu1 %v776_v50  ;;  %943 = vadd.xlane.f32.xlu0 %v942_v52 }
 0x1a0   :  { %v838_v53 = vpop.permute.xlu1 %837  ;;  %v751_v54 = vpop.permute.xlu0 %750 }
 0x1a1   :  { %v779_v59 = vsel %vm650_vm5, %v751_v54, 0.0  ;;  %v865_v60 = vsel %vm650_vm5, %v838_v53, 0.0 }
 0x1a2   :  { %949 = vadd.xlane.f32.xlu1 %v948_v55  ;;  %863 = vadd.xlane.f32.xlu0 %v862_v56 }
 0x1a4   :  { %v753_v57 = vpop.permute.xlu1 %752  ;;  %v925_v58 = vpop.permute.xlu0 %924 }
 0x1a5   :  { %v951_v63 = vsel %vm650_vm5, %v925_v58, 0.0  ;;  %v782_v3 = vsel %vm650_vm5, %v753_v57, 0.0 }
 0x1a6   :  { %780 = vadd.xlane.f32.xlu1 %v779_v59  ;;  %866 = vadd.xlane.f32.xlu0 %v865_v60 }
 0x1a8   :  { %v927_v61 = vpop.permute.xlu1 %926  ;;  %v840_v62 = vpop.permute.xlu0 %839 }
 0x1a9   :  { %v868_v0 = vsel %vm650_vm5, %v840_v62, 0.0  ;;  %v954_v8 = vsel %vm650_vm5, %v927_v61, 0.0 }
 0x1aa   :  { %952 = vadd.xlane.f32.xlu1 %v951_v63  ;;  %869 = vadd.xlane.f32.xlu0 %v868_v0 }
 0x1ac   :  { %v842_v2 = vpop.permute.xlu1 %841  ;;  %v755_v5 = vpop.permute.xlu0 %754 }
 0x1ad   :  { %v871_v4 = vsel %vm650_vm5, %v842_v2, 0.0  ;;  %v785_v12 = vsel %vm650_vm5, %v755_v5, 0.0 }
 0x1ae   :  { %783 = vadd.xlane.f32.xlu1 %v782_v3  ;;  %872 = vadd.xlane.f32.xlu0 %v871_v4 }
 0x1b0   :  { %v844_v6 = vpop.permute.xlu1 %843  ;;  %v929_v10 = vpop.permute.xlu0 %928 }
 0x1b1   :  { %v874_v9 = vsel %vm650_vm5, %v844_v6, 0.0  ;;  %v957_v14 = vsel %vm650_vm5, %v929_v10, 0.0 }
 0x1b2   :  { %955 = vadd.xlane.f32.xlu1 %v954_v8  ;;  %875 = vadd.xlane.f32.xlu0 %v874_v9 }
 0x1b4   :  { %v933_v11 = vpop.permute.xlu1 %932  ;;  %v931_v15 = vpop.permute.xlu0 %930 }
 0x1b5   :  { %v963_v13 = vsel %vm650_vm5, %v933_v11, 0.0  ;;  %v960_v16 = vsel %vm650_vm5, %v931_v15, 0.0 }
 0x1b6   :  { %786 = vadd.xlane.f32.xlu1 %v785_v12  ;;  %964 = vadd.xlane.f32.xlu0 %v963_v13 }
 0x1ba   :  { %958 = vadd.xlane.f32.xlu1 %v957_v14 }
 0x1be   :  { %961 = vadd.xlane.f32.xlu1 %v960_v16 }
 0x1ee   :  { %v2437_v18 = vpop.xlane.xlu0 %676 }
 0x1f2   :  { %v2439_v20 = vpop.xlane.xlu0 %688 }
 0x1f3   :  { %3151 = vst [vmem:[#allocation11_spill] sm:$0xff] %v2439_v20  ;;  %v2445_v23 = vpop.xlane.xlu1 %679 }
 0x1f6   :  { %v2441_v21 = vpop.xlane.xlu0 %691 }
 0x1f7   :  { %3152 = vst [vmem:[#allocation12_spill] sm:$0xff] %v2441_v21  ;;  %v2449_v25 = vpop.xlane.xlu1 %682 }
 0x1fa   :  { %v2443_v22 = vpop.xlane.xlu0 %694 }
 0x1fb   :  { %v2453_v28 = vpop.xlane.xlu1 %685 }
 0x1fc   :  { %3154 = vst [vmem:[#allocation14_spill] sm:$0xff] %v2453_v28 }
 0x1fe   :  { %v2447_v24 = vpop.xlane.xlu0 %697 }
 0x1ff   :  { %3153 = vst [vmem:[#allocation13_spill] sm:$0xff] %v2447_v24 }
 0x217   :  { %v2451_v26 = vpop.xlane.xlu0 %765 }
 0x218   :  { %v974_v40 = vmax.f32 %v2437_v18, %v2451_v26 }
 0x21b   :  { %v2455_v29 = vpop.xlane.xlu0 %768  ;;  %v2457_v30 = vpop.xlane.xlu1 %854 }
 0x21c   :  { %v975_v35 = vmax.f32 %v2445_v23, %v2455_v29  ;;  %v982_v46 = vmax.f32 %v974_v40, %v2457_v30 }
 0x21f   :  { %v2459_v31 = vpop.xlane.xlu0 %771 }
 0x220   :  { %v976_v49 = vmax.f32 %v2449_v25, %v2459_v31 }
 0x223   :  { %v2461_v32 = vpop.xlane.xlu1 %860  ;;  %v2463_v34 = vpop.xlane.xlu0 %857 }
 0x224   :  { %v983_v36 = vmax.f32 %v975_v35, %v2463_v34  ;;  %v984_v56 = vmax.f32 %v976_v49, %v2461_v32 }
 0x227   :  { %v2468_v37 = vpop.xlane.xlu1 %946  ;;  %v2470_v38 = vpop.xlane.xlu0 %774 }
 0x228   :  { %3155 = vst [vmem:[#allocation15_spill] sm:$0xff] %v2470_v38  ;;  %v991_v39 = vmax.f32 %v983_v36, %v2468_v37  ;;  %v977_v9 = vmax.f32 %v2453_v28, %v2470_v38 }
 0x22a   :  { %v999_v41 = vsub.f32 %v2445_v23, %v991_v39  ;;  %v1023_v42 = vsub.f32 %v2455_v29, %v991_v39  ;;  %v1047_v43 = vsub.f32 %v2463_v34, %v991_v39  ;;  %v1071_v44 = vsub.f32 %v2468_v37, %v991_v39 }
 0x22b   :  { %v2480_v47 = vpop.xlane.xlu1 %777  ;;  %v2482_v48 = vpop.xlane.xlu0 %943 }
 0x22c   :  { %3156 = vst [vmem:[#allocation16_spill] sm:$0xff] %v2480_v47  ;;  %v1008_v50 = vmul.f32 1.442695, %v999_v41  ;;  %v1032_v52 = vmul.f32 1.442695, %v1023_v42  ;;  %v990_v55 = vmax.f32 %v982_v46, %v2482_v48 }
 0x22d   :  { %v1056_v53 = vmul.f32 1.442695, %v1047_v43  ;;  %v1080_v54 = vmul.f32 1.442695, %v1071_v44 }
 0x22e   :  { %1975 = vpow2.f32 %v1008_v50  ;;  %v998_v57 = vsub.f32 %v2437_v18, %v990_v55  ;;  %v1022_v58 = vsub.f32 %v2451_v26, %v990_v55  ;;  %v1046_v59 = vsub.f32 %v2457_v30, %v990_v55 }
 0x22f   :  { %1977 = vpow2.f32 %v1032_v52  ;;  %v2491_v60 = vpop.xlane.xlu1 %949  ;;  %v2493_v61 = vpop.xlane.xlu0 %863  ;;  %v1070_v62 = vsub.f32 %v2482_v48, %v990_v55  ;;  %v978_v52 = vmax.f32 %v2439_v20, %v2480_v47 }
 0x230   :  { %3157 = vst [vmem:[#allocation17_spill] sm:$0xff] %v2491_v60  ;;  %3158 = vst [vmem:[#allocation18_spill] sm:$0xff] %v2493_v61  ;;  %1979 = vpow2.f32 %v1056_v53  ;;  %v992_v63 = vmax.f32 %v984_v56, %v2491_v60  ;;  %v1006_v0 = vmul.f32 1.442695, %v998_v57  ;;  %v1030_v2 = vmul.f32 1.442695, %v1022_v58 }
 0x231   :  { %1981 = vpow2.f32 %v1080_v54  ;;  %v1054_v3 = vmul.f32 1.442695, %v1046_v59  ;;  %v1078_v4 = vmul.f32 1.442695, %v1070_v62  ;;  %v985_v16 = vmax.f32 %v977_v9, %v2493_v61 }
 0x232   :  { %v1000_v5 = vsub.f32 %v2449_v25, %v992_v63  ;;  %v1024_v6 = vsub.f32 %v2459_v31, %v992_v63  ;;  %v1048_v8 = vsub.f32 %v2461_v32, %v992_v63  ;;  %1983 = vpow2.f32 %v1006_v0 }
 0x233   :  { %v2502_v10 = vpop.xlane.xlu1 %780  ;;  %v2504_v11 = vpop.xlane.xlu0 %866  ;;  %1985 = vpow2.f32 %v1030_v2  ;;  %v1072_v14 = vsub.f32 %v2491_v60, %v992_v63 }
 0x234   :  { %3159 = vst [vmem:[#allocation19_spill] sm:$0xff] %v2502_v10  ;;  %3160 = vst [vmem:[#allocation20_spill] sm:$0xff] %v2504_v11  ;;  %v1010_v12 = vmul.f32 1.442695, %v1000_v5  ;;  %v1034_v13 = vmul.f32 1.442695, %v1024_v6  ;;  %1987 = vpow2.f32 %v1054_v3  ;;  %v986_v3 = vmax.f32 %v978_v52, %v2504_v11 }
 0x235   :  { %1989 = vpow2.f32 %v1078_v4  ;;  %v1058_v15 = vmul.f32 1.442695, %v1048_v8  ;;  %v1082_v40 = vmul.f32 1.442695, %v1072_v14 }
 0x236   :  { %1991 = vpow2.f32 %v1010_v12 }
 0x237   :  { %v2508_v35 = vpop.xlane.xlu1 %952  ;;  %v2510_v36 = vpop.xlane.xlu0 %869  ;;  %1993 = vpow2.f32 %v1034_v13 }
 0x238   :  { %3161 = vst [vmem:[#allocation21_spill] sm:$0xff] %v2508_v35  ;;  %v2512_v39 = vpop.eup %1975  ;;  %v993_v41 = vmax.f32 %v985_v16, %v2508_v35  ;;  %1995 = vpow2.f32 %v1058_v15 }
 0x239   :  { %v2515_v42 = vpop.eup %1977  ;;  %1997 = vpow2.f32 %v1082_v40 }
 0x23a   :  { %v2517_v43 = vpop.eup %1979  ;;  %v1095_v44 = vadd.f32 %v2515_v42, %v2512_v39  ;;  %v1001_v46 = vsub.f32 %v2453_v28, %v993_v41  ;;  %v1025_v49 = vsub.f32 %v2470_v38, %v993_v41  ;;  %v1049_v53 = vsub.f32 %v2493_v61, %v993_v41 }
 0x23b   :  { %v2523_v50 = vpop.eup %1981  ;;  %v1073_v54 = vsub.f32 %v2508_v35, %v993_v41  ;;  %v2529_v55 = vpop.xlane.xlu1 %783 }
 0x23c   :  { %v2531_v56 = vpop.xlane.xlu0 %872  ;;  %v1103_v57 = vadd.f32 %v2517_v43, %v1095_v44  ;;  %v1012_v58 = vmul.f32 1.442695, %v1001_v46  ;;  %v1036_v59 = vmul.f32 1.442695, %v1025_v49  ;;  %v2534_v62 = vpop.eup %1983  ;;  %v1060_v63 = vmul.f32 1.442695, %v1049_v53 }
 0x23d   :  { %v2536_v0 = vpop.eup %1985  ;;  %v1084_v6 = vmul.f32 1.442695, %v1073_v54 }
 0x23e   :  { %v1111_v2 = vadd.f32 %v2523_v50, %v1103_v57  ;;  %1999 = vpow2.f32 %v1012_v58  ;;  %v2540_v4 = vpop.eup %1987  ;;  %v1094_v5 = vadd.f32 %v2536_v0, %v2534_v62 }
 0x23f   :  { %2001 = vpow2.f32 %v1036_v59  ;;  %v2544_v8 = vpop.xlane.xlu1 %955  ;;  %v2546_v9 = vpop.eup %1989 }
 0x240   :  { %3162 = vst [vmem:[#allocation22_spill] sm:$0xff] %v2544_v8  ;;  %2003 = vrcp.f32 %v1111_v2  ;;  %v994_v12 = vmax.f32 %v986_v3, %v2544_v8  ;;  %v2549_v13 = vpop.eup %1991  ;;  %v1102_v14 = vadd.f32 %v2540_v4, %v1094_v5  ;;  %v2552_v15 = vpop.xlane.xlu0 %875 }
 0x241   :  { %2005 = vpow2.f32 %v1060_v63  ;;  %3163 = vst [vmem:[#allocation23_spill] sm:$0xff] %v2552_v15  ;;  %v2554_v16 = vpop.eup %1993  ;;  %v980_v63 = vmax.f32 %v2443_v22, %v2529_v55 }
 0x242   :  { %v1002_v40 = vsub.f32 %v2439_v20, %v994_v12  ;;  %v1026_v41 = vsub.f32 %v2480_v47, %v994_v12  ;;  %v1050_v44 = vsub.f32 %v2504_v11, %v994_v12  ;;  %v1110_v46 = vadd.f32 %v2546_v9, %v1102_v14  ;;  %v2564_v53 = vpop.eup %1995 }
 0x243   :  { %v1096_v49 = vadd.f32 %v2554_v16, %v2549_v13  ;;  %2007 = vpow2.f32 %v1084_v6  ;;  %v2562_v52 = vpop.xlane.xlu1 %786  ;;  %v1074_v2 = vsub.f32 %v2544_v8, %v994_v12  ;;  %v2572_v3 = vpop.eup %1997 }
 0x244   :  { %3164 = vst [vmem:[#allocation24_spill] sm:$0xff] %v2562_v52  ;;  %v1014_v54 = vmul.f32 1.442695, %v1002_v40  ;;  %v1038_v57 = vmul.f32 1.442695, %v1026_v41  ;;  %v981_v58 = vmax.f32 %v2447_v24, %v2562_v52  ;;  %2009 = vrcp.f32 %v1110_v46  ;;  %v2578_v41 = vpop.xlane.xlu0 %964 }
 0x245   :  { %v1104_v59 = vadd.f32 %v2564_v53, %v1096_v49  ;;  %v1062_v5 = vmul.f32 1.442695, %v1050_v44  ;;  %v979_v40 = vmax.f32 %v2441_v21, %v2502_v10  ;;  %3165 = vst [vmem:[#allocation25_spill] sm:$0xff] %v2578_v41  ;;  %v2587_v44 = vmax.f32 %v980_v63, %v2531_v56 }
 0x246   :  { %2011 = vpow2.f32 %v1014_v54  ;;  %v989_v6 = vmax.f32 %v981_v58, %v2552_v15  ;;  %v1086_v54 = vmul.f32 1.442695, %v1074_v2 }
 0x247   :  { %v1112_v14 = vadd.f32 %v2572_v3, %v1104_v59  ;;  %2013 = vpow2.f32 %v1038_v57  ;;  %v987_v12 = vmax.f32 %v979_v40, %v2510_v36  ;;  %v2589_v58 = vpop.xlane.xlu1 %958 }
 0x248   :  { %v2580_v46 = vpop.eup %1999  ;;  %v997_v49 = vmax.f32 %v989_v6, %v2578_v41 }
 0x249   :  { %v2583_v11 = vpop.eup %2001  ;;  %2015 = vrcp.f32 %v1112_v14 }
 0x24a   :  { %v2004_v59 = vpop.eup %2003  ;;  %v1097_v57 = vadd.f32 %v2583_v11, %v2580_v46  ;;  %2017 = vpow2.f32 %v1062_v5  ;;  %v1005_v8 = vsub.f32 %v2447_v24, %v997_v49  ;;  %v1029_v6 = vsub.f32 %v2562_v52, %v997_v49 }
 0x24b   :  { %v2595_v20 = vpop.eup %2005  ;;  %v1127_v14 = vmul.f32 %v2004_v59, %v2512_v39  ;;  %v1199_v40 = vmul.f32 %v2004_v59, %v2515_v42  ;;  %v1303_v63 = vmul.f32 %v2004_v59, %v2517_v43  ;;  %v1407_v2 = vmul.f32 %v2004_v59, %v2523_v50 }
 0x24c   :  { %v1105_v47 = vadd.f32 %v2595_v20, %v1097_v57  ;;  %v1020_v35 = vmul.f32 1.442695, %v1005_v8  ;;  %v1053_v61 = vsub.f32 %v2552_v15, %v997_v49  ;;  %v2604_v5 = vmax.f32 %v987_v12, %v2589_v58 }
 0x24d   :  { %v2606_v24 = vpop.eup %2007  ;;  %v1135_v52 = vmul.f32 %v1127_v14, %v2295_v19  ;;  %v1207_v39 = vmul.f32 %v1199_v40, %v2295_v19  ;;  %v1311_v42 = vmul.f32 %v1303_v63, %v2295_v19  ;;  %v1415_v43 = vmul.f32 %v1407_v2, %v2295_v19 }
 0x24e   :  { %v1113_v50 = vadd.f32 %v2606_v24, %v1105_v47  ;;  %2019 = vpow2.f32 %v1086_v54  ;;  %v1044_v59 = vmul.f32 1.442695, %v1029_v6  ;;  %v1077_v8 = vsub.f32 %v2578_v41, %v997_v49  ;;  %v2010_v57 = vpop.eup %2009 }
 0x24f   :  { %v1143_v12 = vsel %vm650_vm5, %v1135_v52, 0.0  ;;  %v1215_v15 = vsel %vm707_vm2, %v1207_v39, 0.0  ;;  %2021 = vpow2.f32 %v1020_v35  ;;  %v1068_v60 = vmul.f32 1.442695, %v1053_v61 }
 0x250   :  { %v2616_v14 = vpop.eup %2011  ;;  %v1126_v40 = vmul.f32 %v2010_v57, %v2534_v62  ;;  %v1198_v63 = vmul.f32 %v2010_v57, %v2536_v0  ;;  %v1302_v2 = vmul.f32 %v2010_v57, %v2540_v4  ;;  %v1406_v47 = vmul.f32 %v2010_v57, %v2546_v9 }
 0x251   :  { %v2622_v54 = vpop.eup %2013  ;;  %v1319_v49 = vsel %vm796_vm3, %v1311_v42, 0.0  ;;  %v1423_v52 = vsel %vm885_vm4, %v1415_v43, 0.0  ;;  %2023 = vrcp.f32 %v1113_v50  ;;  %v1092_v6 = vmul.f32 1.442695, %v1077_v8 }
 0x252   :  { %v1134_v61 = vmul.f32 %v1126_v40, %v2293_v17  ;;  %v1206_v35 = vmul.f32 %v1198_v63, %v2293_v17  ;;  %v1310_v62 = vmul.f32 %v1302_v2, %v2293_v17  ;;  %v1414_v0 = vmul.f32 %v1406_v47, %v2293_v17 }
 0x253   :  { %v2016_v39 = vpop.eup %2015  ;;  %v1098_v4 = vadd.f32 %v2622_v54, %v2616_v14  ;;  %2025 = vpow2.f32 %v1044_v59  ;;  %v1003_v9 = vsub.f32 %v2441_v21, %v2604_v5  ;;  %v1027_v42 = vsub.f32 %v2502_v10, %v2604_v5 }
 0x254   :  { %v2636_v43 = vpop.eup %2017  ;;  %v1142_v50 = vsel %vm650_vm5, %v1134_v61, 0.0  ;;  %v1214_v8 = vsel %vm707_vm2, %v1206_v35, 0.0  ;;  %v1318_v57 = vsel %vm796_vm3, %v1310_v62, 0.0  ;;  %v1422_v40 = vsel %vm885_vm4, %v1414_v0, 0.0 }
 0x255   :  { %v1144_v63 = vadd.f32 %v1143_v12, %v1142_v50  ;;  %v1216_v2 = vadd.f32 %v1215_v15, %v1214_v8  ;;  %v1320_v47 = vadd.f32 %v1319_v49, %v1318_v57  ;;  %v1424_v59 = vadd.f32 %v1423_v52, %v1422_v40 }
 0x256   :  { %v1128_v41 = vmul.f32 %v2016_v39, %v2549_v13  ;;  %v1200_v21 = vmul.f32 %v2016_v39, %v2554_v16  ;;  %v1304_v10 = vmul.f32 %v2016_v39, %v2564_v53  ;;  %v1408_v38 = vmul.f32 %v2016_v39, %v2572_v3 }
 0x257   :  { %v1106_v61 = vadd.f32 %v2636_v43, %v1098_v4  ;;  %2027 = vpow2.f32 %v1068_v60  ;;  %v1016_v35 = vmul.f32 1.442695, %v1003_v9  ;;  %v1040_v28 = vmul.f32 1.442695, %v1027_v42 }
 0x258   :  { %v2647_v62 = vpop.eup %2019  ;;  %v1136_v12 = vmul.f32 %v1128_v41, %v2303_v27  ;;  %v1208_v15 = vmul.f32 %v1200_v21, %v2303_v27  ;;  %v1312_v49 = vmul.f32 %v1304_v10, %v2303_v27  ;;  %v1416_v13 = vmul.f32 %v1408_v38, %v2303_v27  ;;  %v2664_v38 = vpop.xlane.xlu1 %961 }
 0x259   :  { %v2653_v16 = vpop.eup %2021  ;;  %v1114_v53 = vadd.f32 %v2647_v62, %v1106_v61  ;;  %2029 = vpow2.f32 %v1092_v6  ;;  %v1051_v60 = vsub.f32 %v2510_v36, %v2604_v5  ;;  %v1075_v3 = vsub.f32 %v2589_v58, %v2604_v5 }
 0x25a   :  { %v1145_v52 = vsel %vm650_vm5, %v1136_v12, 0.0  ;;  %v1217_v41 = vsel %vm707_vm2, %v1208_v15, 0.0  ;;  %v1321_v21 = vsel %vm796_vm3, %v1312_v49, 0.0  ;;  %v1425_v10 = vsel %vm885_vm4, %v1416_v13, 0.0 }
 0x25b   :  { %v2024_v0 = vpop.eup %2023  ;;  %v1146_v39 = vadd.f32 %v1145_v52, %v1144_v63  ;;  %v1218_v4 = vadd.f32 %v1217_v41, %v1216_v2  ;;  %v1322_v6 = vadd.f32 %v1321_v21, %v1320_v47  ;;  %v1426_v9 = vadd.f32 %v1425_v10, %v1424_v59 }
 0x25c   :  { %v1129_v42 = vmul.f32 %v2024_v0, %v2580_v46  ;;  %v1201_v50 = vmul.f32 %v2024_v0, %v2583_v11  ;;  %v1305_v5 = vmul.f32 %v2024_v0, %v2595_v20  ;;  %v1409_v8 = vmul.f32 %v2024_v0, %v2606_v24 }
 0x25d   :  { %v2670_v57 = vpop.eup %2025  ;;  %2031 = vrcp.f32 %v1114_v53  ;;  %v1064_v40 = vmul.f32 1.442695, %v1051_v60  ;;  %v1088_v61 = vmul.f32 1.442695, %v1075_v3  ;;  %v996_v12 = vmax.f32 %v2587_v44, %v2664_v38 }
 0x25e   :  { %v1137_v63 = vmul.f32 %v1129_v42, %v2309_v33  ;;  %v1209_v2 = vmul.f32 %v1201_v50, %v2309_v33  ;;  %v1313_v46 = vmul.f32 %v1305_v5, %v2309_v33  ;;  %v1417_v11 = vmul.f32 %v1409_v8, %v2309_v33 }
 0x25f   :  { %v1101_v20 = vadd.f32 %v2670_v57, %v2653_v16  ;;  %2033 = vpow2.f32 %v1016_v35  ;;  %v1004_v24 = vsub.f32 %v2443_v22, %v996_v12  ;;  %v1028_v47 = vsub.f32 %v2529_v55, %v996_v12 }
 0x260   :  { %v1147_v59 = vsel %vm650_vm5, %v1137_v63, 0.0  ;;  %v1219_v44 = vsel %vm707_vm2, %v1209_v2, 0.0  ;;  %v1323_v15 = vsel %vm796_vm3, %v1313_v46, 0.0  ;;  %v1427_v49 = vsel %vm885_vm4, %v1417_v11, 0.0 }
 0x261   :  { %v2686_v13 = vpop.eup %2027  ;;  %v1148_v53 = vadd.f32 %v1147_v59, %v1146_v39  ;;  %v1220_v60 = vadd.f32 %v1219_v44, %v1218_v4  ;;  %v1324_v3 = vadd.f32 %v1323_v15, %v1322_v6  ;;  %v1428_v52 = vadd.f32 %v1427_v49, %v1426_v9 }
 0x262   :  { %v1109_v35 = vadd.f32 %v2686_v13, %v1101_v20  ;;  %2035 = vpow2.f32 %v1040_v28  ;;  %v1018_v41 = vmul.f32 1.442695, %v1004_v24  ;;  %v1042_v10 = vmul.f32 1.442695, %v1028_v47 }
 0x263   :  { %v2030_v21 = vpop.eup %2029  ;;  %2037 = vpow2.f32 %v1064_v40  ;;  %v1052_v0 = vsub.f32 %v2531_v56, %v996_v12  ;;  %v1076_v42 = vsub.f32 %v2664_v38, %v996_v12 }
 0x264   :  { %v1117_v50 = vadd.f32 %v2030_v21, %v1109_v35  ;;  %2039 = vpow2.f32 %v1088_v61 }
 0x265   :  { %2041 = vpow2.f32 %v1018_v41  ;;  %v1066_v5 = vmul.f32 1.442695, %v1052_v0  ;;  %v1090_v4 = vmul.f32 1.442695, %v1076_v42 }
 0x266   :  { %2043 = vrcp.f32 %v1117_v50 }
 0x267   :  { %v2032_v39 = vpop.eup %2031  ;;  %2045 = vpow2.f32 %v1042_v10 }
 0x268   :  { %v1130_v6 = vmul.f32 %v2032_v39, %v2616_v14  ;;  %v1202_v28 = vmul.f32 %v2032_v39, %v2622_v54  ;;  %v1306_v9 = vmul.f32 %v2032_v39, %v2636_v43  ;;  %v1410_v8 = vmul.f32 %v2032_v39, %v2647_v62 }
 0x269   :  { %v2034_v40 = vpop.eup %2033  ;;  %2047 = vpow2.f32 %v1066_v5 }
 0x26a   :  { %v1138_v12 = vmul.f32 %v1130_v6, %v2317_v45  ;;  %v1210_v61 = vmul.f32 %v1202_v28, %v2317_v45  ;;  %v1314_v63 = vmul.f32 %v1306_v9, %v2317_v45  ;;  %v1418_v2 = vmul.f32 %v1410_v8, %v2317_v45 }
 0x26b   :  { %2049 = vpow2.f32 %v1090_v4 }
 0x26c   :  { %v2036_v46 = vpop.eup %2035  ;;  %v1149_v14 = vsel %vm650_vm5, %v1138_v12, 0.0  ;;  %v1221_v54 = vsel %vm707_vm2, %v1210_v61, 0.0  ;;  %v1325_v43 = vsel %vm796_vm3, %v1314_v63, 0.0  ;;  %v1429_v62 = vsel %vm885_vm4, %v1418_v2, 0.0 }
 0x26d   :  { %v2038_v11 = vpop.eup %2037  ;;  %v1150_v20 = vadd.f32 %v1149_v14, %v1148_v53  ;;  %v1222_v24 = vadd.f32 %v1221_v54, %v1220_v60  ;;  %v1326_v47 = vadd.f32 %v1325_v43, %v1324_v3  ;;  %v1430_v59 = vadd.f32 %v1429_v62, %v1428_v52 }
 0x26e   :  { %v2040_v44 = vpop.eup %2039  ;;  %v1099_v15 = vadd.f32 %v2036_v46, %v2034_v40 }
 0x26f   :  { %v2042_v49 = vpop.eup %2041 }
 0x270   :  { %v2044_v35 = vpop.eup %2043  ;;  %v1107_v41 = vadd.f32 %v2038_v11, %v1099_v15 }
 0x271   :  { %v2046_v10 = vpop.eup %2045  ;;  %v1133_v0 = vmul.f32 %v2044_v35, %v2653_v16  ;;  %v1205_v2 = vmul.f32 %v2044_v35, %v2670_v57  ;;  %v1309_v14 = vmul.f32 %v2044_v35, %v2686_v13  ;;  %v1413_v54 = vmul.f32 %v2044_v35, %v2030_v21 }
 0x272   :  { %v1115_v42 = vadd.f32 %v2040_v44, %v1107_v41  ;;  %v1100_v50 = vadd.f32 %v2046_v10, %v2042_v49 }
 0x273   :  { %v2048_v5 = vpop.eup %2047  ;;  %v1141_v39 = vmul.f32 %v1133_v0, %v2334_v7  ;;  %v1213_v57 = vmul.f32 %v1205_v2, %v2334_v7  ;;  %v1317_v13 = vmul.f32 %v1309_v14, %v2334_v7  ;;  %v1421_v21 = vmul.f32 %v1413_v54, %v2334_v7 }
 0x274   :  { %2051 = vrcp.f32 %v1115_v42  ;;  %v1108_v4 = vadd.f32 %v2048_v5, %v1100_v50 }
 0x275   :  { %v2050_v6 = vpop.eup %2049 }
 0x276   :  { %v1116_v53 = vadd.f32 %v2050_v6, %v1108_v4 }
 0x278   :  { %2053 = vrcp.f32 %v1116_v53 }
 0x27e   :  { %v2052_v60 = vpop.eup %2051 }
 0x27f   :  { %v1131_v3 = vmul.f32 %v2052_v60, %v2034_v40  ;;  %v1203_v52 = vmul.f32 %v2052_v60, %v2036_v46  ;;  %v1307_v28 = vmul.f32 %v2052_v60, %v2038_v11  ;;  %v1411_v9 = vmul.f32 %v2052_v60, %v2040_v44 }
 0x281   :  { %v1139_v8 = vmul.f32 %v1131_v3, %v2321_v51  ;;  %v1211_v12 = vmul.f32 %v1203_v52, %v2321_v51  ;;  %v1315_v16 = vmul.f32 %v1307_v28, %v2321_v51  ;;  %v1419_v61 = vmul.f32 %v1411_v9, %v2321_v51 }
 0x282   :  { %v2054_v63 = vpop.eup %2053  ;;  %v1155_v52 = vsel %vm650_vm5, %v1141_v39, 0.0  ;;  %v1227_v28 = vsel %vm707_vm2, %v1213_v57, 0.0  ;;  %v1331_v9 = vsel %vm796_vm3, %v1317_v13, 0.0 }
 0x283   :  { %v1151_v43 = vsel %vm650_vm5, %v1139_v8, 0.0  ;;  %v1223_v40 = vsel %vm707_vm2, %v1211_v12, 0.0  ;;  %v1327_v46 = vsel %vm796_vm3, %v1315_v16, 0.0  ;;  %v1431_v62 = vsel %vm885_vm4, %v1419_v61, 0.0 }
 0x284   :  { %v1152_v11 = vadd.f32 %v1151_v43, %v1150_v20  ;;  %v1224_v44 = vadd.f32 %v1223_v40, %v1222_v24  ;;  %v1328_v15 = vadd.f32 %v1327_v46, %v1326_v47  ;;  %v1432_v41 = vadd.f32 %v1431_v62, %v1430_v59 }
 0x285   :  { %v1132_v0 = vmul.f32 %v2054_v63, %v2042_v49  ;;  %v1204_v42 = vmul.f32 %v2054_v63, %v2046_v10  ;;  %v1308_v50 = vmul.f32 %v2054_v63, %v2048_v5  ;;  %v1412_v4 = vmul.f32 %v2054_v63, %v2050_v6 }
 0x286   :  { %v1435_v8 = vsel %vm885_vm4, %v1421_v21, 0.0 }
 0x287   :  { %v1140_v35 = vmul.f32 %v1132_v0, %v2330_v1  ;;  %v1212_v53 = vmul.f32 %v1204_v42, %v2330_v1  ;;  %v1316_v60 = vmul.f32 %v1308_v50, %v2330_v1  ;;  %v1420_v20 = vmul.f32 %v1412_v4, %v2330_v1 }
 0x289   :  { %v1153_v24 = vsel %vm650_vm5, %v1140_v35, 0.0  ;;  %v1225_v47 = vsel %vm707_vm2, %v1212_v53, 0.0  ;;  %v1329_v59 = vsel %vm796_vm3, %v1316_v60, 0.0  ;;  %v1433_v49 = vsel %vm885_vm4, %v1420_v20, 0.0 }
 0x28a   :  { %v1154_v10 = vadd.f32 %v1153_v24, %v1152_v11  ;;  %v1226_v5 = vadd.f32 %v1225_v47, %v1224_v44  ;;  %v1330_v6 = vadd.f32 %v1329_v59, %v1328_v15  ;;  %v1434_v3 = vadd.f32 %v1433_v49, %v1432_v41 }
 0x28c   :  { %v1156_v12 = vadd.f32 %v1155_v52, %v1154_v10  ;;  %v1228_v16 = vadd.f32 %v1227_v28, %v1226_v5  ;;  %v1332_v61 = vadd.f32 %v1331_v9, %v1330_v6  ;;  %v1436_v63 = vadd.f32 %v1435_v8, %v1434_v3 }
 0x28e   :  { %v1229_v2 = vadd.f32 0.1, %v1228_v16  ;;  %v1333_v14 = vadd.f32 0.1, %v1332_v61  ;;  %v1437_v54 = vadd.f32 0.1, %v1436_v63 }
 0x28f   :  { %v1157_v41 = vadd.f32 0.1, %v1156_v12 }
 0x290   :  { %v1231_v43 = vmul.f32 %v1229_v2, %v2295_v19  ;;  %v1230_v40 = vmul.f32 %v1229_v2, %v2293_v17  ;;  %v1335_v46 = vmul.f32 %v1333_v14, %v2295_v19  ;;  %v1232_v39 = vmul.f32 %v1229_v2, %v2303_v27 }
 0x291   :  { %v1336_v62 = vmul.f32 %v1333_v14, %v2303_v27  ;;  %v1334_v11 = vmul.f32 %v1333_v14, %v2293_v17  ;;  %v1439_v44 = vmul.f32 %v1437_v54, %v2295_v19  ;;  %v1233_v15 = vmul.f32 %v1229_v2, %v2309_v33 }
 0x292   :  { %1248 = vrot.lane.b32.xlu0 %v1231_v43, %s2231_s1  ;;  %1246 = vrot.lane.b32.xlu1 %v1230_v40, %s2231_s1  ;;  %v1337_v0 = vmul.f32 %v1333_v14, %v2309_v33  ;;  %v1438_v42 = vmul.f32 %v1437_v54, %v2293_v17  ;;  %v1235_v50 = vmul.f32 %v1229_v2, %v2321_v51 }
 0x293   :  { %v1234_v4 = vmul.f32 %v1229_v2, %v2317_v45  ;;  %v1441_v57 = vmul.f32 %v1437_v54, %v2309_v33  ;;  %v1440_v13 = vmul.f32 %v1437_v54, %v2303_v27  ;;  %v1339_v21 = vmul.f32 %v1333_v14, %v2321_v51 }
 0x294   :  { %v1338_v35 = vmul.f32 %v1333_v14, %v2317_v45  ;;  %v1237_v53 = vmul.f32 %v1229_v2, %v2334_v7  ;;  %v1236_v60 = vmul.f32 %v1229_v2, %v2330_v1  ;;  %v1443_v20 = vmul.f32 %v1437_v54, %v2321_v51 }
 0x295   :  { %v1442_v24 = vmul.f32 %v1437_v54, %v2317_v45  ;;  %v1444_v47 = vmul.f32 %v1437_v54, %v2330_v1  ;;  %v1340_v59 = vmul.f32 %v1333_v14, %v2330_v1  ;;  %v1341_v49 = vmul.f32 %v1333_v14, %v2334_v7 }
 0x296   :  { %1352 = vrot.lane.b32.xlu0 %v1335_v46, %s2232_s8  ;;  %1250 = vrot.lane.b32.xlu1 %v1232_v39, %s2231_s1  ;;  %v1445_v10 = vmul.f32 %v1437_v54, %v2334_v7  ;;  %v1158_v5 = vmul.f32 %v1157_v41, %v2293_v17  ;;  %v1162_v6 = vmul.f32 %v1157_v41, %v2317_v45 }
 0x297   :  { %v1163_v3 = vmul.f32 %v1157_v41, %v2321_v51  ;;  %v1164_v52 = vmul.f32 %v1157_v41, %v2330_v1  ;;  %v1159_v28 = vmul.f32 %v1157_v41, %v2295_v19  ;;  %v1165_v9 = vmul.f32 %v1157_v41, %v2334_v7 }
 0x298   :  { %v1160_v8 = vmul.f32 %v1157_v41, %v2303_v27  ;;  %v1161_v12 = vmul.f32 %v1157_v41, %v2309_v33  ;;  %v1166_v16 = vsel %vm650_vm5, %v1158_v5, 0.0  ;;  %v1178_v61 = vsel %vm650_vm5, %v1162_v6, 0.0 }
 0x299   :  { %v1181_v63 = vsel %vm650_vm5, %v1163_v3, 0.0  ;;  %v1184_v2 = vsel %vm650_vm5, %v1164_v52, 0.0  ;;  %v1169_v14 = vsel %vm650_vm5, %v1159_v28, 0.0  ;;  %v1187_v54 = vsel %vm650_vm5, %v1165_v9, 0.0 }
 0x29a   :  { %1354 = vrot.lane.b32.xlu0 %v1336_v62, %s2232_s8  ;;  %1350 = vrot.lane.b32.xlu1 %v1334_v11, %s2232_s8  ;;  %v1172_v43 = vsel %vm650_vm5, %v1160_v8, 0.0  ;;  %v1175_v40 = vsel %vm650_vm5, %v1161_v12, 0.0 }
 0x29e   :  { %1456 = vrot.lane.b32.xlu0 %v1439_v44, %s2233_s9  ;;  %1252 = vrot.lane.b32.xlu1 %v1233_v15, %s2231_s1 }
 0x2a2   :  { %1356 = vrot.lane.b32.xlu0 %v1337_v0, %s2232_s8  ;;  %1454 = vrot.lane.b32.xlu1 %v1438_v42, %s2233_s9 }
 0x2a6   :  { %1256 = vrot.lane.b32.xlu0 %v1235_v50, %s2231_s1  ;;  %1254 = vrot.lane.b32.xlu1 %v1234_v4, %s2231_s1 }
 0x2aa   :  { %1460 = vrot.lane.b32.xlu0 %v1441_v57, %s2233_s9  ;;  %1458 = vrot.lane.b32.xlu1 %v1440_v13, %s2233_s9 }
 0x2ae   :  { %1360 = vrot.lane.b32.xlu0 %v1339_v21, %s2232_s8  ;;  %1358 = vrot.lane.b32.xlu1 %v1338_v35, %s2232_s8 }
 0x2b2   :  { %1260 = vrot.lane.b32.xlu0 %v1237_v53, %s2231_s1  ;;  %1258 = vrot.lane.b32.xlu1 %v1236_v60, %s2231_s1 }
 0x2b6   :  { %1464 = vrot.lane.b32.xlu0 %v1443_v20, %s2233_s9  ;;  %1462 = vrot.lane.b32.xlu1 %v1442_v24, %s2233_s9 }
 0x2ba   :  { %1466 = vrot.lane.b32.xlu0 %v1444_v47, %s2233_s9  ;;  %1362 = vrot.lane.b32.xlu1 %v1340_v59, %s2232_s8 }
 0x2be   :  { %1364 = vrot.lane.b32.xlu1 %v1341_v49, %s2232_s8 }
 0x2c2   :  { %1468 = vrot.lane.b32.xlu1 %v1445_v10, %s2233_s9 }
 0x2d9   :  { %1167 = vadd.xlane.f32.xlu0 %v1166_v16 }
 0x2dd   :  { %1179 = vadd.xlane.f32.xlu0 %v1178_v61 }
 0x2e1   :  { %1182 = vadd.xlane.f32.xlu0 %v1181_v63 }
 0x2e5   :  { %1185 = vadd.xlane.f32.xlu0 %v1184_v2 }
 0x2e6   :  { %1170 = vadd.xlane.f32.xlu1 %v1169_v14 }
 0x2e9   :  { %1188 = vadd.xlane.f32.xlu0 %v1187_v54 }
 0x2ea   :  { %1173 = vadd.xlane.f32.xlu1 %v1172_v43 }
 0x2ee   :  { %1176 = vadd.xlane.f32.xlu1 %v1175_v40 }
 0x304   :  { %v1249_v46 = vpop.permute.xlu0 %1248  ;;  %v1247_v39 = vpop.permute.xlu1 %1246 }
 0x305   :  { %v1270_v62 = vsel %vm650_vm5, %v1247_v39, 0.0  ;;  %v1273_v15 = vsel %vm650_vm5, %v1249_v46, 0.0 }
 0x306   :  { %1271 = vadd.xlane.f32.xlu0 %v1270_v62 }
 0x308   :  { %v1353_v11 = vpop.permute.xlu0 %1352  ;;  %v1251_v44 = vpop.permute.xlu1 %1250 }
 0x309   :  { %v1276_v50 = vsel %vm650_vm5, %v1251_v44, 0.0  ;;  %v1377_v21 = vsel %vm650_vm5, %v1353_v11, 0.0 }
 0x30a   :  { %1274 = vadd.xlane.f32.xlu0 %v1273_v15 }
 0x30c   :  { %v1355_v41 = vpop.permute.xlu0 %1354  ;;  %v1351_v0 = vpop.permute.xlu1 %1350 }
 0x30d   :  { %v1374_v42 = vsel %vm650_vm5, %v1351_v0, 0.0  ;;  %v1380_v13 = vsel %vm650_vm5, %v1355_v41, 0.0 }
 0x30e   :  { %1375 = vadd.xlane.f32.xlu1 %v1374_v42  ;;  %1277 = vadd.xlane.f32.xlu0 %v1276_v50 }
 0x310   :  { %v1457_v4 = vpop.permute.xlu0 %1456  ;;  %v1253_v57 = vpop.permute.xlu1 %1252 }
 0x311   :  { %v1279_v60 = vsel %vm650_vm5, %v1253_v57, 0.0  ;;  %v1481_v20 = vsel %vm650_vm5, %v1457_v4, 0.0 }
 0x312   :  { %1381 = vadd.xlane.f32.xlu1 %v1380_v13  ;;  %1378 = vadd.xlane.f32.xlu0 %v1377_v21 }
 0x314   :  { %v1357_v35 = vpop.permute.xlu0 %1356  ;;  %v1455_v53 = vpop.permute.xlu1 %1454 }
 0x315   :  { %v1478_v59 = vsel %vm650_vm5, %v1455_v53, 0.0  ;;  %v1383_v6 = vsel %vm650_vm5, %v1357_v35, 0.0 }
 0x316   :  { %1482 = vadd.xlane.f32.xlu1 %v1481_v20  ;;  %1280 = vadd.xlane.f32.xlu0 %v1279_v60 }
 0x318   :  { %v1257_v24 = vpop.permute.xlu0 %1256  ;;  %v1255_v47 = vpop.permute.xlu1 %1254 }
 0x319   :  { %v1282_v49 = vsel %vm650_vm5, %v1255_v47, 0.0  ;;  %v1285_v9 = vsel %vm650_vm5, %v1257_v24, 0.0 }
 0x31a   :  { %1283 = vadd.xlane.f32.xlu1 %v1282_v49  ;;  %1479 = vadd.xlane.f32.xlu0 %v1478_v59 }
 0x31c   :  { %v1461_v10 = vpop.permute.xlu0 %1460  ;;  %v1459_v5 = vpop.permute.xlu1 %1458 }
 0x31d   :  { %v1484_v3 = vsel %vm650_vm5, %v1459_v5, 0.0  ;;  %v1487_v16 = vsel %vm650_vm5, %v1461_v10, 0.0 }
 0x31e   :  { %1485 = vadd.xlane.f32.xlu1 %v1484_v3  ;;  %1384 = vadd.xlane.f32.xlu0 %v1383_v6 }
 0x320   :  { %v1359_v52 = vpop.permute.xlu1 %1358  ;;  %v1361_v8 = vpop.permute.xlu0 %1360 }
 0x321   :  { %v1386_v28 = vsel %vm650_vm5, %v1359_v52, 0.0  ;;  %v1389_v61 = vsel %vm650_vm5, %v1361_v8, 0.0 }
 0x322   :  { %1286 = vadd.xlane.f32.xlu1 %v1285_v9  ;;  %1387 = vadd.xlane.f32.xlu0 %v1386_v28 }
 0x324   :  { %v1259_v12 = vpop.permute.xlu1 %1258  ;;  %v1261_v14 = vpop.permute.xlu0 %1260 }
 0x325   :  { %v1288_v2 = vsel %vm650_vm5, %v1259_v12, 0.0  ;;  %v1291_v62 = vsel %vm650_vm5, %v1261_v14, 0.0 }
 0x326   :  { %1488 = vadd.xlane.f32.xlu1 %v1487_v16  ;;  %1390 = vadd.xlane.f32.xlu0 %v1389_v61 }
 0x328   :  { %v1463_v63 = vpop.permute.xlu1 %1462  ;;  %v1465_v46 = vpop.permute.xlu0 %1464 }
 0x329   :  { %v1490_v43 = vsel %vm650_vm5, %v1463_v63, 0.0  ;;  %v1493_v15 = vsel %vm650_vm5, %v1465_v46, 0.0 }
 0x32a   :  { %1289 = vadd.xlane.f32.xlu1 %v1288_v2 }
 0x32c   :  { %v1363_v54 = vpop.permute.xlu1 %1362  ;;  %v1467_v0 = vpop.permute.xlu0 %1466 }
 0x32d   :  { %v1392_v40 = vsel %vm650_vm5, %v1363_v54, 0.0  ;;  %v1496_v42 = vsel %vm650_vm5, %v1467_v0, 0.0 }
 0x32e   :  { %1491 = vadd.xlane.f32.xlu1 %v1490_v43  ;;  %1393 = vadd.xlane.f32.xlu0 %v1392_v40 }
 0x330   :  { %v1365_v39 = vpop.permute.xlu1 %1364 }
 0x331   :  { %v1395_v11 = vsel %vm650_vm5, %v1365_v39, 0.0 }
 0x332   :  { %1292 = vadd.xlane.f32.xlu1 %v1291_v62  ;;  %1396 = vadd.xlane.f32.xlu0 %v1395_v11 }
 0x334   :  { %v1469_v44 = vpop.permute.xlu1 %1468 }
 0x335   :  { %v1499_v41 = vsel %vm650_vm5, %v1469_v44, 0.0 }
 0x336   :  { %1494 = vadd.xlane.f32.xlu1 %v1493_v15  ;;  %1500 = vadd.xlane.f32.xlu0 %v1499_v41 }
 0x33a   :  { %1497 = vadd.xlane.f32.xlu1 %v1496_v42 }
 0x366   :  { %v1168_v50 = vpop.xlane.xlu0 %1167 }
 0x367   :  { %v1190_v61 = vadd.f32 %v1168_v50, %v2437_v18  ;;  %v3167_v50 = vld [vmem:[#allocation15_spill] sm:$0xff] }
 0x36a   :  { %v2818_v4 = vpop.xlane.xlu0 %1179 }
 0x36e   :  { %v2820_v57 = vpop.xlane.xlu0 %1182 }
 0x372   :  { %v2822_v13 = vpop.xlane.xlu0 %1185 }
 0x373   :  { %v1171_v21 = vpop.xlane.xlu1 %1170 }
 0x374   :  { %v1191_v6 = vadd.f32 %v1171_v21, %v2445_v23 }
 0x376   :  { %v2824_v35 = vpop.xlane.xlu0 %1188 }
 0x377   :  { %v1174_v53 = vpop.xlane.xlu1 %1173 }
 0x378   :  { %v1192_v14 = vadd.f32 %v1174_v53, %v2449_v25  ;;  %v3168_v53 = vld [vmem:[#allocation17_spill] sm:$0xff] }
 0x37b   :  { %v1177_v20 = vpop.xlane.xlu1 %1176 }
 0x393   :  { %v1272_v60 = vpop.xlane.xlu0 %1271 }
 0x394   :  { %v1294_v28 = vadd.f32 %v1272_v60, %v2451_v26 }
 0x396   :  { %v1510_v23 = vmax.f32 %v1190_v61, %v1294_v28 }
 0x397   :  { %v1275_v24 = vpop.xlane.xlu0 %1274 }
 0x398   :  { %v1295_v49 = vadd.f32 %v1275_v24, %v2455_v29 }
 0x39a   :  { %v1511_v52 = vmax.f32 %v1191_v6, %v1295_v49 }
 0x39b   :  { %v1376_v47 = vpop.xlane.xlu1 %1375  ;;  %v1278_v59 = vpop.xlane.xlu0 %1277 }
 0x39c   :  { %v1398_v63 = vadd.f32 %v1376_v47, %v2457_v30  ;;  %v1296_v29 = vadd.f32 %v1278_v59, %v2459_v31  ;;  %v3166_v31 = vld [vmem:[#allocation14_spill] sm:$0xff] }
 0x39d   :  { %v1193_v15 = vadd.f32 %v1177_v20, %v3166_v31 }
 0x39e   :  { %v1518_v62 = vmax.f32 %v1510_v23, %v1398_v63  ;;  %v1512_v18 = vmax.f32 %v1192_v14, %v1296_v29 }
 0x39f   :  { %v1382_v10 = vpop.xlane.xlu1 %1381  ;;  %v1379_v5 = vpop.xlane.xlu0 %1378 }
 0x3a0   :  { %v1399_v3 = vadd.f32 %v1379_v5, %v2463_v34  ;;  %v1400_v34 = vadd.f32 %v1382_v10, %v2461_v32  ;;  %v3169_v10 = vld [vmem:[#allocation18_spill] sm:$0xff] }
 0x3a2   :  { %v1519_v12 = vmax.f32 %v1511_v52, %v1399_v3  ;;  %v1520_v32 = vmax.f32 %v1512_v18, %v1400_v34 }
 0x3a3   :  { %v1483_v9 = vpop.xlane.xlu1 %1482  ;;  %v1281_v8 = vpop.xlane.xlu0 %1280 }
 0x3a4   :  { %v1503_v16 = vadd.f32 %v1483_v9, %v2468_v37  ;;  %v1297_v21 = vadd.f32 %v1281_v8, %v3167_v50 }
 0x3a6   :  { %v1527_v2 = vmax.f32 %v1519_v12, %v1503_v16 }
 0x3a7   :  { %v1284_v54 = vpop.xlane.xlu1 %1283  ;;  %v1480_v43 = vpop.xlane.xlu0 %1479 }
 0x3a8   :  { %v1535_v26 = vsub.f32 %v1191_v6, %v1527_v2  ;;  %v1559_v40 = vsub.f32 %v1295_v49, %v1527_v2  ;;  %v1583_v46 = vsub.f32 %v1399_v3, %v1527_v2  ;;  %v1607_v39 = vsub.f32 %v1503_v16, %v1527_v2 }
 0x3a9   :  { %v1502_v37 = vadd.f32 %v1480_v43, %v2482_v48  ;;  %v1513_v2 = vmax.f32 %v1193_v15, %v1297_v21 }
 0x3aa   :  { %v1544_v11 = vmul.f32 1.442695, %v1535_v26  ;;  %v1568_v30 = vmul.f32 1.442695, %v1559_v40  ;;  %v1592_v44 = vmul.f32 1.442695, %v1583_v46 }
 0x3ab   :  { %v1616_v41 = vmul.f32 1.442695, %v1607_v39  ;;  %v1526_v25 = vmax.f32 %v1518_v62, %v1502_v37  ;;  %v1486_v0 = vpop.xlane.xlu1 %1485  ;;  %v1385_v42 = vpop.xlane.xlu0 %1384  ;;  %v3170_v46 = vld [vmem:[#allocation21_spill] sm:$0xff]  ;;  %v3171_v62 = vld [vmem:[#allocation16_spill] sm:$0xff] }
 0x3ac   :  { %2055 = vpow2.f32 %v1544_v11  ;;  %v1504_v60 = vadd.f32 %v1486_v0, %v3168_v53  ;;  %v1401_v5 = vadd.f32 %v1385_v42, %v3169_v10  ;;  %v3172_v11 = vld [vmem:[#allocation11_spill] sm:$0xff] }
 0x3ad   :  { %2057 = vpow2.f32 %v1568_v30  ;;  %v1534_v24 = vsub.f32 %v1190_v61, %v1526_v25  ;;  %v1558_v47 = vsub.f32 %v1294_v28, %v1526_v25  ;;  %v1582_v48 = vsub.f32 %v1398_v63, %v1526_v25 }
 0x3ae   :  { %2059 = vpow2.f32 %v1592_v44  ;;  %v1606_v59 = vsub.f32 %v1502_v37, %v1526_v25  ;;  %v1528_v49 = vmax.f32 %v1520_v32, %v1504_v60  ;;  %v1521_v40 = vmax.f32 %v1513_v2, %v1401_v5  ;;  %v3173_v44 = vld [vmem:[#allocation20_spill] sm:$0xff] }
 0x3af   :  { %2061 = vpow2.f32 %v1616_v41  ;;  %v1542_v20 = vmul.f32 1.442695, %v1534_v24  ;;  %v1566_v6 = vmul.f32 1.442695, %v1558_v47  ;;  %v1590_v3 = vmul.f32 1.442695, %v1582_v48  ;;  %v1287_v52 = vpop.xlane.xlu1 %1286  ;;  %v1388_v23 = vpop.xlane.xlu0 %1387 }
 0x3b0   :  { %v1614_v9 = vmul.f32 1.442695, %v1606_v59  ;;  %v1536_v12 = vsub.f32 %v1192_v14, %v1528_v49  ;;  %v1560_v16 = vsub.f32 %v1296_v29, %v1528_v49  ;;  %v1584_v8 = vsub.f32 %v1400_v34, %v1528_v49 }
 0x3b1   :  { %2063 = vpow2.f32 %v1542_v20  ;;  %v1608_v63 = vsub.f32 %v1504_v60, %v1528_v49  ;;  %v2843_v37 = vadd.f32 %v1284_v54, %v3171_v62  ;;  %v1194_v30 = vadd.f32 %v2818_v4, %v3172_v11  ;;  %v3174_v60 = vld [vmem:[#allocation19_spill] sm:$0xff]  ;;  %v3175_v20 = vld [vmem:[#allocation12_spill] sm:$0xff] }
 0x3b2   :  { %2065 = vpow2.f32 %v1566_v6  ;;  %v1546_v28 = vmul.f32 1.442695, %v1536_v12  ;;  %v1570_v61 = vmul.f32 1.442695, %v1560_v16  ;;  %v1594_v26 = vmul.f32 1.442695, %v1584_v8 }
 0x3b3   :  { %2067 = vpow2.f32 %v1590_v3  ;;  %v1489_v43 = vpop.xlane.xlu1 %1488  ;;  %v1618_v14 = vmul.f32 1.442695, %v1608_v63  ;;  %v1402_v31 = vadd.f32 %v1388_v23, %v3173_v44  ;;  %v1391_v41 = vpop.xlane.xlu0 %1390  ;;  %v1514_v53 = vmax.f32 %v1194_v30, %v2843_v37  ;;  %v3176_v8 = vld [vmem:[#allocation22_spill] sm:$0xff]  ;;  %v3177_v63 = vld [vmem:[#allocation13_spill] sm:$0xff] }
 0x3b4   :  { %2069 = vpow2.f32 %v1614_v9  ;;  %v1505_v39 = vadd.f32 %v1489_v43, %v3170_v46  ;;  %v2860_v24 = vadd.f32 %v1287_v52, %v3174_v60  ;;  %v2870_v3 = vadd.f32 %v1391_v41, %v2510_v36 }
 0x3b5   :  { %2071 = vpow2.f32 %v1546_v28  ;;  %v2890_v43 = vadd.f32 %v2824_v35, %v3177_v63 }
 0x3b6   :  { %v2845_v29 = vpop.eup %2055  ;;  %2073 = vpow2.f32 %v1570_v61  ;;  %v1529_v34 = vmax.f32 %v1521_v40, %v1505_v39  ;;  %v2886_v61 = vadd.f32 %v2822_v13, %v2443_v22 }
 0x3b7   :  { %v2847_v18 = vpop.eup %2057  ;;  %v1290_v25 = vpop.xlane.xlu1 %1289  ;;  %2075 = vpow2.f32 %v1594_v26 }
 0x3b8   :  { %v2852_v0 = vpop.eup %2059  ;;  %v1631_v54 = vadd.f32 %v2847_v18, %v2845_v29  ;;  %v1537_v42 = vsub.f32 %v1193_v15, %v1529_v34  ;;  %v1561_v32 = vsub.f32 %v1297_v21, %v1529_v34  ;;  %v1585_v4 = vsub.f32 %v1401_v5, %v1529_v34 }
 0x3b9   :  { %v2856_v50 = vpop.eup %2061  ;;  %v1609_v47 = vsub.f32 %v1505_v39, %v1529_v34  ;;  %2077 = vpow2.f32 %v1618_v14  ;;  %v2867_v15 = vadd.f32 %v2820_v57, %v3175_v20  ;;  %v1522_v21 = vmax.f32 %v1514_v53, %v1402_v31 }
 0x3ba   :  { %v1639_v48 = vadd.f32 %v2852_v0, %v1631_v54  ;;  %v1548_v59 = vmul.f32 1.442695, %v1537_v42  ;;  %v1572_v49 = vmul.f32 1.442695, %v1561_v32  ;;  %v1596_v6 = vmul.f32 1.442695, %v1585_v4 }
 0x3bb   :  { %v2863_v10 = vpop.eup %2063  ;;  %v1492_v52 = vpop.xlane.xlu1 %1491  ;;  %v1620_v16 = vmul.f32 1.442695, %v1609_v47  ;;  %v1515_v28 = vmax.f32 %v2867_v15, %v2860_v24  ;;  %v2897_v62 = vadd.f32 %v1290_v25, %v2529_v55  ;;  %v3178_v42 = vld [vmem:[#allocation24_spill] sm:$0xff] }
 0x3bc   :  { %v1394_v9 = vpop.xlane.xlu0 %1393  ;;  %v2872_v5 = vpop.eup %2065  ;;  %v1647_v12 = vadd.f32 %v2856_v50, %v1639_v48  ;;  %2079 = vpow2.f32 %v1548_v59  ;;  %v1506_v2 = vadd.f32 %v1492_v52, %v3176_v8 }
 0x3bd   :  { %v2876_v23 = vpop.eup %2067  ;;  %v1630_v57 = vadd.f32 %v2872_v5, %v2863_v10  ;;  %2081 = vpow2.f32 %v1572_v49  ;;  %v1523_v39 = vmax.f32 %v1515_v28, %v2870_v3  ;;  %v2911_v4 = vadd.f32 %v1394_v9, %v2531_v56 }
 0x3be   :  { %v2882_v36 = vpop.eup %2069  ;;  %2083 = vrcp.f32 %v1647_v12  ;;  %v1530_v26 = vmax.f32 %v1522_v21, %v1506_v2  ;;  %v1516_v9 = vmax.f32 %v2886_v61, %v2897_v62 }
 0x3bf   :  { %v2892_v40 = vpop.eup %2071  ;;  %v1638_v46 = vadd.f32 %v2876_v23, %v1630_v57  ;;  %2085 = vpow2.f32 %v1596_v6  ;;  %v1293_v14 = vpop.xlane.xlu1 %1292  ;;  %v3180_v6 = vld [vmem:[#allocation25_spill] sm:$0xff] }
 0x3c0   :  { %v1397_v34 = vpop.xlane.xlu0 %1396  ;;  %v2899_v22 = vpop.eup %2073  ;;  %2087 = vpow2.f32 %v1620_v16  ;;  %v1538_v13 = vsub.f32 %v1194_v30, %v1530_v26  ;;  %v1562_v35 = vsub.f32 %v2843_v37, %v1530_v26  ;;  %v1586_v11 = vsub.f32 %v1402_v31, %v1530_v26  ;;  %v3179_v31 = vld [vmem:[#allocation23_spill] sm:$0xff] }
 0x3c1   :  { %v1646_v44 = vadd.f32 %v2882_v36, %v1638_v46  ;;  %v1632_v41 = vadd.f32 %v2899_v22, %v2892_v40  ;;  %v1610_v54 = vsub.f32 %v1506_v2, %v1530_v26  ;;  %v2906_v32 = vadd.f32 %v1293_v14, %v3178_v42  ;;  %v2908_v55 = vpop.eup %2075 }
 0x3c2   :  { %v1550_v25 = vmul.f32 1.442695, %v1538_v13  ;;  %v1574_v53 = vmul.f32 1.442695, %v1562_v35  ;;  %v1598_v60 = vmul.f32 1.442695, %v1586_v11  ;;  %v2917_v47 = vadd.f32 %v1397_v34, %v3179_v31 }
 0x3c3   :  { %2089 = vrcp.f32 %v1646_v44  ;;  %v1640_v37 = vadd.f32 %v2908_v55, %v1632_v41  ;;  %v1517_v30 = vmax.f32 %v2890_v43, %v2906_v32  ;;  %v1495_v48 = vpop.xlane.xlu1 %1494  ;;  %v2919_v49 = vpop.eup %2077  ;;  %v1622_v20 = vmul.f32 1.442695, %v1610_v54 }
 0x3c4   :  { %v1501_v59 = vpop.xlane.xlu0 %1500  ;;  %2091 = vpow2.f32 %v1550_v25  ;;  %v1507_v21 = vadd.f32 %v1495_v48, %v2589_v58  ;;  %v1524_v58 = vmax.f32 %v1516_v9, %v2911_v4 }
 0x3c5   :  { %v2923_v56 = vadd.f32 %v1501_v59, %v3180_v6  ;;  %v1648_v52 = vadd.f32 %v2919_v49, %v1640_v37  ;;  %2093 = vpow2.f32 %v1574_v53  ;;  %v1525_v12 = vmax.f32 %v1517_v30, %v2917_v47 }
 0x3c6   :  { %v2929_v16 = vpop.eup %2079  ;;  %2095 = vpow2.f32 %v1598_v60  ;;  %v1531_v8 = vmax.f32 %v1523_v39, %v1507_v21 }
 0x3c7   :  { %v2931_v2 = vpop.eup %2081  ;;  %2097 = vrcp.f32 %v1648_v52  ;;  %v1533_v57 = vmax.f32 %v1525_v12, %v2923_v56 }
 0x3c8   :  { %v2084_v28 = vpop.eup %2083  ;;  %v1633_v63 = vadd.f32 %v2931_v2, %v2929_v16  ;;  %2099 = vpow2.f32 %v1622_v20  ;;  %v1539_v26 = vsub.f32 %v2867_v15, %v1531_v8  ;;  %v1563_v46 = vsub.f32 %v2860_v24, %v1531_v8 }
 0x3c9   :  { %v2939_v14 = vpop.eup %2085  ;;  %v2942_v39 = vmul.f32 %v2084_v28, %v2845_v29  ;;  %v1711_v34 = vmul.f32 %v2084_v28, %v2847_v18  ;;  %v1768_v13 = vmul.f32 %v2084_v28, %v2852_v0  ;;  %v1825_v35 = vmul.f32 %v2084_v28, %v2856_v50 }
 0x3ca   :  { %v2947_v11 = vpop.eup %2087  ;;  %v1641_v44 = vadd.f32 %v2939_v14, %v1633_v63  ;;  %v1552_v41 = vmul.f32 1.442695, %v1539_v26  ;;  %v1576_v54 = vmul.f32 1.442695, %v1563_v46  ;;  %v1587_v15 = vsub.f32 %v2870_v3, %v1531_v8 }
 0x3cb   :  { %v2952_v24 = vmul.f32 %v1711_v34, %v2295_v19  ;;  %v1776_v29 = vmul.f32 %v1768_v13, %v2295_v19  ;;  %v1833_v42 = vmul.f32 %v1825_v35, %v2295_v19  ;;  %v1611_v18 = vsub.f32 %v1507_v21, %v1531_v8  ;;  %v1498_v21 = vpop.xlane.xlu1 %1497 }
 0x3cc   :  { %v1649_v0 = vadd.f32 %v2947_v11, %v1641_v44  ;;  %2101 = vpow2.f32 %v1552_v41  ;;  %v1600_v50 = vmul.f32 1.442695, %v1587_v15  ;;  %v1541_v25 = vsub.f32 %v2890_v43, %v1533_v57 }
 0x3cd   :  { %v2090_v53 = vpop.eup %2089  ;;  %v1841_v60 = vsel %vm885_vm4, %v1833_v42, 0.0  ;;  %2103 = vpow2.f32 %v1576_v54  ;;  %v1624_v37 = vmul.f32 1.442695, %v1611_v18  ;;  %v1565_v3 = vsub.f32 %v2906_v32, %v1533_v57 }
 0x3ce   :  { %v2960_v30 = vpop.eup %2091  ;;  %v2963_v31 = vmul.f32 %v2090_v53, %v2863_v10  ;;  %v1710_v48 = vmul.f32 %v2090_v53, %v2872_v5  ;;  %v1767_v59 = vmul.f32 %v2090_v53, %v2876_v23  ;;  %v1824_v20 = vmul.f32 %v2090_v53, %v2882_v36 }
 0x3cf   :  { %v2968_v43 = vpop.eup %2093  ;;  %2105 = vrcp.f32 %v1649_v0  ;;  %v1556_v6 = vmul.f32 1.442695, %v1541_v25  ;;  %v1580_v52 = vmul.f32 1.442695, %v1565_v3  ;;  %v1589_v9 = vsub.f32 %v2917_v47, %v1533_v57 }
 0x3d0   :  { %v2971_v32 = vpop.eup %2095  ;;  %v1718_v12 = vmul.f32 %v1710_v48, %v2293_v17  ;;  %v1775_v10 = vmul.f32 %v1767_v59, %v2293_v17  ;;  %v1832_v5 = vmul.f32 %v1824_v20, %v2293_v17  ;;  %v1634_v23 = vadd.f32 %v2968_v43, %v2960_v30 }
 0x3d1   :  { %v2978_v36 = vpop.eup %2097  ;;  %2107 = vpow2.f32 %v1600_v50  ;;  %v1604_v8 = vmul.f32 1.442695, %v1589_v9  ;;  %v1613_v28 = vsub.f32 %v2923_v56, %v1533_v57  ;;  %v1508_v63 = vadd.f32 %v1498_v21, %v2664_v38 }
 0x3d2   :  { %v2982_v47 = vpop.eup %2099  ;;  %v1840_v26 = vsel %vm885_vm4, %v1832_v5, 0.0  ;;  %v1712_v46 = vmul.f32 %v2978_v36, %v2899_v22  ;;  %v1769_v34 = vmul.f32 %v2978_v36, %v2908_v55  ;;  %v1826_v13 = vmul.f32 %v2978_v36, %v2919_v49 }
 0x3d3   :  { %v1842_v35 = vadd.f32 %v1841_v60, %v1840_v26  ;;  %v1642_v44 = vadd.f32 %v2971_v32, %v1634_v23  ;;  %2109 = vpow2.f32 %v1624_v37  ;;  %v1628_v56 = vmul.f32 1.442695, %v1613_v28 }
 0x3d4   :  { %v1834_v38 = vmul.f32 %v1826_v13, %v2303_v27  ;;  %2111 = vpow2.f32 %v1556_v6  ;;  %v1532_v57 = vmax.f32 %v1524_v58, %v1508_v63  ;;  %v1777_v41 = vmul.f32 %v1769_v34, %v2303_v27 }
 0x3d5   :  { %v1650_v54 = vadd.f32 %v2982_v47, %v1642_v44  ;;  %2113 = vpow2.f32 %v1580_v52  ;;  %v1783_v22 = vsel %vm796_vm3, %v1775_v10, 0.0  ;;  %v1784_v55 = vsel %vm796_vm3, %v1776_v29, 0.0 }
 0x3d6   :  { %v2997_v15 = vpop.eup %2101  ;;  %v1843_v49 = vsel %vm885_vm4, %v1834_v38, 0.0  ;;  %2115 = vpow2.f32 %v1604_v8  ;;  %v1540_v42 = vsub.f32 %v2886_v61, %v1532_v57  ;;  %v1564_v18 = vsub.f32 %v2897_v62, %v1532_v57 }
 0x3d7   :  { %v3002_v0 = vpop.eup %2103  ;;  %v1844_v58 = vadd.f32 %v1843_v49, %v1842_v35  ;;  %2117 = vrcp.f32 %v1650_v54  ;;  %v1588_v50 = vsub.f32 %v2911_v4, %v1532_v57  ;;  %v1612_v25 = vsub.f32 %v1508_v63, %v1532_v57 }
 0x3d8   :  { %v1635_v53 = vadd.f32 %v3002_v0, %v2997_v15  ;;  %2119 = vpow2.f32 %v1628_v56  ;;  %v1554_v29 = vmul.f32 1.442695, %v1540_v42  ;;  %v1578_v60 = vmul.f32 1.442695, %v1564_v18 }
 0x3d9   :  { %v2106_v37 = vpop.eup %2105  ;;  %v1602_v3 = vmul.f32 1.442695, %v1588_v50  ;;  %v1626_v48 = vmul.f32 1.442695, %v1612_v25  ;;  %v1785_v59 = vadd.f32 %v1784_v55, %v1783_v22  ;;  %v1786_v61 = vsel %vm796_vm3, %v1777_v41, 0.0 }
 0x3da   :  { %v1713_v62 = vmul.f32 %v2106_v37, %v2931_v2  ;;  %v1770_v20 = vmul.f32 %v2106_v37, %v2939_v14  ;;  %v1827_v21 = vmul.f32 %v2106_v37, %v2947_v11  ;;  %2121 = vpow2.f32 %v1554_v29 }
 0x3db   :  { %v3011_v4 = vpop.eup %2107  ;;  %2123 = vpow2.f32 %v1578_v60  ;;  %v1787_v6 = vadd.f32 %v1786_v61, %v1785_v59  ;;  %v1720_v52 = vmul.f32 %v1712_v46, %v2303_v27  ;;  %v1726_v9 = vsel %vm707_vm2, %v1718_v12, 0.0 }
 0x3dc   :  { %v1835_v10 = vmul.f32 %v1827_v21, %v2309_v33  ;;  %v1643_v5 = vadd.f32 %v3011_v4, %v1635_v53  ;;  %2125 = vpow2.f32 %v1602_v3  ;;  %v1778_v2 = vmul.f32 %v1770_v20, %v2309_v33 }
 0x3dd   :  { %v2110_v23 = vpop.eup %2109  ;;  %2127 = vpow2.f32 %v1626_v48  ;;  %v1721_v14 = vmul.f32 %v1713_v62, %v2309_v33  ;;  %v1727_v11 = vsel %vm707_vm2, %v2952_v24, 0.0  ;;  %v1729_v8 = vsel %vm707_vm2, %v1720_v52, 0.0 }
 0x3de   :  { %v3022_v28 = vpop.eup %2111  ;;  %v1845_v12 = vsel %vm885_vm4, %v1835_v10, 0.0  ;;  %v1651_v63 = vadd.f32 %v2110_v23, %v1643_v5  ;;  %v1788_v26 = vsel %vm796_vm3, %v1778_v2, 0.0  ;;  %v1728_v46 = vadd.f32 %v1727_v11, %v1726_v9 }
 0x3df   :  { %v3026_v34 = vpop.eup %2113  ;;  %v1789_v13 = vadd.f32 %v1788_v26, %v1787_v6  ;;  %v1731_v35 = vsel %vm707_vm2, %v1721_v14, 0.0  ;;  %v1846_v44 = vadd.f32 %v1845_v12, %v1844_v58  ;;  %v1664_v56 = vmul.f32 %v2978_v36, %v2892_v40 }
 0x3e0   :  { %v3031_v24 = vpop.eup %2115  ;;  %2129 = vrcp.f32 %v1651_v63  ;;  %v1637_v38 = vadd.f32 %v3026_v34, %v3022_v28  ;;  %v1730_v57 = vadd.f32 %v1729_v8, %v1728_v46  ;;  %v1665_v41 = vmul.f32 %v2106_v37, %v2929_v16 }
 0x3e1   :  { %v2118_v54 = vpop.eup %2117  ;;  %v1670_v22 = vmul.f32 %v2963_v31, %v2293_v17  ;;  %v1671_v55 = vmul.f32 %v2942_v39, %v2295_v19  ;;  %v1672_v49 = vmul.f32 %v1664_v56, %v2303_v27 }
 0x3e2   :  { %v2120_v42 = vpop.eup %2119  ;;  %v1828_v40 = vmul.f32 %v2118_v54, %v2982_v47  ;;  %v1645_v36 = vadd.f32 %v3031_v24, %v1637_v38  ;;  %v1771_v18 = vmul.f32 %v2118_v54, %v2971_v32  ;;  %v1714_v58 = vmul.f32 %v2118_v54, %v2968_v43 }
 0x3e3   :  { %v1732_v50 = vadd.f32 %v1731_v35, %v1730_v57  ;;  %v1666_v16 = vmul.f32 %v2118_v54, %v2960_v30  ;;  %v1673_v25 = vmul.f32 %v1665_v41, %v2309_v33  ;;  %v1678_v17 = vsel %vm650_vm5, %v1670_v22, 0.0 }
 0x3e4   :  { %v2122_v31 = vpop.eup %2121  ;;  %v1836_v19 = vmul.f32 %v1828_v40, %v2317_v45  ;;  %v1653_v27 = vadd.f32 %v2120_v42, %v1645_v36  ;;  %v1779_v39 = vmul.f32 %v1771_v18, %v2317_v45  ;;  %v1722_v47 = vmul.f32 %v1714_v58, %v2317_v45 }
 0x3e5   :  { %v2124_v53 = vpop.eup %2123  ;;  %v1674_v32 = vmul.f32 %v1666_v16, %v2317_v45  ;;  %v1679_v43 = vsel %vm650_vm5, %v1671_v55, 0.0  ;;  %v1681_v29 = vsel %vm650_vm5, %v1672_v49, 0.0  ;;  %v1683_v6 = vsel %vm650_vm5, %v1673_v25, 0.0 }
 0x3e6   :  { %v2126_v30 = vpop.eup %2125  ;;  %2131 = vrcp.f32 %v1653_v27  ;;  %v1636_v33 = vadd.f32 %v2124_v53, %v2122_v31  ;;  %v1790_v60 = vsel %vm796_vm3, %v1779_v39, 0.0  ;;  %v1733_v37 = vsel %vm707_vm2, %v1722_v47, 0.0 }
 0x3e7   :  { %v2128_v3 = vpop.eup %2127  ;;  %v1791_v48 = vadd.f32 %v1790_v60, %v1789_v13  ;;  %v1734_v59 = vadd.f32 %v1733_v37, %v1732_v50  ;;  %v1847_v61 = vsel %vm885_vm4, %v1836_v19, 0.0  ;;  %v1680_v62 = vadd.f32 %v1679_v43, %v1678_v17 }
 0x3e8   :  { %v1644_v20 = vadd.f32 %v2126_v30, %v1636_v33  ;;  %v1848_v21 = vadd.f32 %v1847_v61, %v1846_v44  ;;  %v1685_v10 = vsel %vm650_vm5, %v1674_v32, 0.0 }
 0x3e9   :  { %v1682_v45 = vadd.f32 %v1681_v29, %v1680_v62 }
 0x3ea   :  { %v2130_v52 = vpop.eup %2129  ;;  %v1652_v9 = vadd.f32 %v2128_v3, %v1644_v20 }
 0x3eb   :  { %v1829_v5 = vmul.f32 %v2130_v52, %v2110_v23  ;;  %v1772_v2 = vmul.f32 %v2130_v52, %v3011_v4  ;;  %v1715_v14 = vmul.f32 %v2130_v52, %v3002_v0  ;;  %v1667_v11 = vmul.f32 %v2130_v52, %v2997_v15 }
 0x3ec   :  { %2133 = vrcp.f32 %v1652_v9  ;;  %v1684_v8 = vadd.f32 %v1683_v6, %v1682_v45 }
 0x3ed   :  { %v1837_v12 = vmul.f32 %v1829_v5, %v2321_v51  ;;  %v1780_v63 = vmul.f32 %v1772_v2, %v2321_v51  ;;  %v1723_v26 = vmul.f32 %v1715_v14, %v2321_v51  ;;  %v1675_v46 = vmul.f32 %v1667_v11, %v2321_v51 }
 0x3ee   :  { %v1686_v13 = vadd.f32 %v1685_v10, %v1684_v8 }
 0x3ef   :  { %v1792_v35 = vsel %vm796_vm3, %v1780_v63, 0.0  ;;  %v1735_v23 = vsel %vm707_vm2, %v1723_v26, 0.0  ;;  %v1849_v4 = vsel %vm885_vm4, %v1837_v12, 0.0  ;;  %v1687_v0 = vsel %vm650_vm5, %v1675_v46, 0.0 }
 0x3f0   :  { %v2132_v15 = vpop.eup %2131  ;;  %v1793_v44 = vadd.f32 %v1792_v35, %v1791_v48  ;;  %v1736_v56 = vadd.f32 %v1735_v23, %v1734_v59  ;;  %v1850_v38 = vadd.f32 %v1849_v4, %v1848_v21  ;;  %v1688_v57 = vadd.f32 %v1687_v0, %v1686_v13 }
 0x3f1   :  { %v1669_v41 = vmul.f32 %v2132_v15, %v3022_v28  ;;  %v1831_v22 = vmul.f32 %v2132_v15, %v2120_v42  ;;  %v1774_v51 = vmul.f32 %v2132_v15, %v3031_v24  ;;  %v1717_v55 = vmul.f32 %v2132_v15, %v3026_v34 }
 0x3f3   :  { %v1677_v54 = vmul.f32 %v1669_v41, %v2334_v7  ;;  %v1782_v50 = vmul.f32 %v1774_v51, %v2334_v7  ;;  %v1725_v16 = vmul.f32 %v1717_v55, %v2334_v7  ;;  %v1839_v25 = vmul.f32 %v1831_v22, %v2334_v7 }
 0x3f5   :  { %v1796_v32 = vsel %vm796_vm3, %v1782_v50, 0.0  ;;  %v1739_v43 = vsel %vm707_vm2, %v1725_v16, 0.0  ;;  %v1853_v29 = vsel %vm885_vm4, %v1839_v25, 0.0 }
 0x3f6   :  { %v2134_v49 = vpop.eup %2133 }
 0x3f7   :  { %v1830_v40 = vmul.f32 %v2134_v49, %v2128_v3  ;;  %v1773_v36 = vmul.f32 %v2134_v49, %v2126_v30  ;;  %v1716_v18 = vmul.f32 %v2134_v49, %v2124_v53  ;;  %v1668_v58 = vmul.f32 %v2134_v49, %v2122_v31 }
 0x3f9   :  { %v1781_v28 = vmul.f32 %v1773_v36, %v2330_v1  ;;  %v1724_v17 = vmul.f32 %v1716_v18, %v2330_v1  ;;  %v1838_v42 = vmul.f32 %v1830_v40, %v2330_v1  ;;  %v1676_v24 = vmul.f32 %v1668_v58, %v2330_v1 }
 0x3fa   :  { %v1691_v1 = vsel %vm650_vm5, %v1677_v54, 0.0 }
 0x3fb   :  { %v1794_v34 = vsel %vm796_vm3, %v1781_v28, 0.0  ;;  %v1737_v19 = vsel %vm707_vm2, %v1724_v17, 0.0  ;;  %v1851_v31 = vsel %vm885_vm4, %v1838_v42, 0.0  ;;  %v1689_v27 = vsel %vm650_vm5, %v1676_v24, 0.0 }
 0x3fc   :  { %v1795_v39 = vadd.f32 %v1794_v34, %v1793_v44  ;;  %v1738_v47 = vadd.f32 %v1737_v19, %v1736_v56  ;;  %v1852_v53 = vadd.f32 %v1851_v31, %v1850_v38  ;;  %v1690_v7 = vadd.f32 %v1689_v27, %v1688_v57 }
 0x3fe   :  { %v1797_v30 = vadd.f32 %v1796_v32, %v1795_v39  ;;  %v1740_v33 = vadd.f32 %v1739_v43, %v1738_v47  ;;  %v1854_v60 = vadd.f32 %v1853_v29, %v1852_v53  ;;  %v1692_v37 = vadd.f32 %v1691_v1, %v1690_v7 }
 0x400   :  { %v3089_v3 = vadd.f32 0.1, %v1797_v30  ;;  %v3091_v48 = vadd.f32 0.1, %v1740_v33  ;;  %v3097_v62 = vadd.f32 0.1, %v1854_v60 }
 0x401   :  { %v1693_v21 = vadd.f32 0.1, %v1692_v37 }
 0x402   :  { %v1799_v59 = vmul.f32 %v3089_v3, %v3089_v3  ;;  %v1742_v61 = vmul.f32 %v3091_v48, %v3091_v48  ;;  %v1856_v20 = vmul.f32 %v3097_v62, %v3097_v62 }
 0x403   :  { %v1694_v45 = vmul.f32 %v1693_v21, %v1693_v21 }
 0x404   :  { %1801 = vrot.lane.b32.xlu0 %v1799_v59, %s2232_s8  ;;  %1744 = vrot.lane.b32.xlu1 %v1742_v61, %s2231_s1 }
 0x405   :  { %v1695_v6 = vsel %vm650_vm5, %v1694_v45, 0.0 }
 0x408   :  { %1858 = vrot.lane.b32.xlu1 %v1856_v20, %s2233_s9 }
 0x42c   :  { %1696 = vadd.xlane.f32.xlu1 %v1695_v6 }
 0x476   :  { %v1802_v52 = vpop.permute.xlu0 %1801  ;;  %v1745_v9 = vpop.permute.xlu1 %1744 }
 0x477   :  { %v1804_v10 = vsel %vm650_vm5, %v1802_v52, 0.0  ;;  %v1747_v5 = vsel %vm650_vm5, %v1745_v9, 0.0 }
 0x478   :  { %1748 = vadd.xlane.f32.xlu0 %v1747_v5  ;;  %1805 = vadd.xlane.f32.xlu1 %v1804_v10 }
 0x47a   :  { %v1859_v2 = vpop.permute.xlu1 %1858 }
 0x47b   :  { %v1861_v14 = vsel %vm650_vm5, %v1859_v2, 0.0 }
 0x47c   :  { %1862 = vadd.xlane.f32.xlu1 %v1861_v14 }
 0x4b9   :  { %v1697_v11 = vpop.xlane.xlu1 %1696 }
 0x4ba   :  { %2135 = vrsqrt.f32 %v1697_v11  ;;  %v1705_v8 = vadd.f32 1.0, %v1697_v11  ;;  %vm1700_vm6 = vcmp.eq.f32.partialorder %v1697_v11, inf  ;;  %v1703_v26 = vand.u32 2147483648, %v1697_v11 }
 0x4bb   :  { %vm1702_vm7 = vcmp.eq.f32.partialorder %v1697_v11, 0.0 }
 0x4bc   :  { %2137 = vrcp.f32 %v1705_v8 }
 0x4c4   :  { %v2136_v12 = vpop.eup %2135 }
 0x4c5   :  { %v1699_v63 = vmul.f32 %v2136_v12, %v1697_v11 }
 0x4c6   :  { %v2138_v13 = vpop.eup %2137 }
 0x4c7   :  { %v1701_v46 = vsel %vm1700_vm6, %v1697_v11, %v1699_v63 }
 0x4c8   :  { %v1704_v35 = vsel %vm1702_vm7, %v1703_v26, %v1701_v46 }
 0x4c9   :  { %v1707_v23 = vmul.f32 %v2138_v13, %v1704_v35 }
 0x4cb   :  { %v1708_v4 = vmul.f32 %v1707_v23, %v1693_v21 }
 0x4cd   :  { %1709 = vst.msk [vmem:[#allocation7] sm:$0x3] %vm650_vm5, %v1708_v4 }
 0x505   :  { %v1749_v0 = vpop.xlane.xlu0 %1748  ;;  %v1806_v15 = vpop.xlane.xlu1 %1805 }
 0x506   :  { %2139 = vrsqrt.f32 %v1749_v0  ;;  %v1757_v44 = vadd.f32 1.0, %v1749_v0  ;;  %v1814_v56 = vadd.f32 1.0, %v1806_v15  ;;  %vm1752_vm8 = vcmp.eq.f32.partialorder %v1749_v0, inf }
 0x507   :  { %2141 = vrsqrt.f32 %v1806_v15  ;;  %v1755_v55 = vand.u32 2147483648, %v1749_v0  ;;  %vm1754_vm9 = vcmp.eq.f32.partialorder %v1749_v0, 0.0  ;;  %vm1809_vm10 = vcmp.eq.f32.partialorder %v1806_v15, inf }
 0x508   :  { %2143 = vrcp.f32 %v1757_v44  ;;  %v1812_v36 = vand.u32 2147483648, %v1806_v15  ;;  %vm1811_vm11 = vcmp.eq.f32.partialorder %v1806_v15, 0.0 }
 0x509   :  { %v1863_v38 = vpop.xlane.xlu1 %1862 }
 0x50a   :  { %2145 = vrsqrt.f32 %v1863_v38  ;;  %v1871_v57 = vadd.f32 1.0, %v1863_v38  ;;  %vm1866_vm12 = vcmp.eq.f32.partialorder %v1863_v38, inf  ;;  %v1869_v24 = vand.u32 2147483648, %v1863_v38 }
 0x50b   :  { %2147 = vrcp.f32 %v1814_v56  ;;  %vm1868_vm13 = vcmp.eq.f32.partialorder %v1863_v38, 0.0 }
 0x50c   :  { %2149 = vrcp.f32 %v1871_v57 }
 0x510   :  { %v2140_v41 = vpop.eup %2139 }
 0x511   :  { %v2142_v54 = vpop.eup %2141  ;;  %v1751_v22 = vmul.f32 %v2140_v41, %v1749_v0 }
 0x512   :  { %v1808_v51 = vmul.f32 %v2142_v54, %v1806_v15  ;;  %v2144_v49 = vpop.eup %2143 }
 0x513   :  { %v1753_v40 = vsel %vm1752_vm8, %v1749_v0, %v1751_v22 }
 0x514   :  { %v2146_v18 = vpop.eup %2145  ;;  %v1756_v58 = vsel %vm1754_vm9, %v1755_v55, %v1753_v40  ;;  %v1810_v50 = vsel %vm1809_vm10, %v1806_v15, %v1808_v51 }
 0x515   :  { %v2148_v16 = vpop.eup %2147  ;;  %v1865_v25 = vmul.f32 %v2146_v18, %v1863_v38  ;;  %v1759_v28 = vmul.f32 %v2144_v49, %v1756_v58  ;;  %v1813_v17 = vsel %vm1811_vm11, %v1812_v36, %v1810_v50 }
 0x516   :  { %v1816_v42 = vmul.f32 %v2148_v16, %v1813_v17  ;;  %v2150_v31 = vpop.eup %2149 }
 0x517   :  { %v1760_v34 = vmul.f32 %v1759_v28, %v3091_v48  ;;  %v1867_v19 = vsel %vm1866_vm12, %v1863_v38, %v1865_v25 }
 0x518   :  { %v1817_v27 = vmul.f32 %v1816_v42, %v3089_v3  ;;  %v1870_v39 = vsel %vm1868_vm13, %v1869_v24, %v1867_v19 }
 0x519   :  { %1762 = vrot.lane.b32.xlu0 %v1760_v34, %s2231_s1  ;;  %v1873_v47 = vmul.f32 %v2150_v31, %v1870_v39 }
 0x51a   :  { %1819 = vrot.lane.b32.xlu1 %v1817_v27, %s2232_s8 }
 0x51b   :  { %v1874_v53 = vmul.f32 %v1873_v47, %v3097_v62 }
 0x51d   :  { %1876 = vrot.lane.b32.xlu0 %v1874_v53, %s2233_s9 }
 0x58b   :  { %v1763_v7 = vpop.permute.xlu0 %1762 }
 0x58c   :  { %1766 = vst.msk [vmem:[#allocation7 + $0x2] sm:$0x3] %vm650_vm5, %v1763_v7  ;;  %v1820_v32 = vpop.permute.xlu1 %1819 }
 0x58d   :  { %1823 = vst.msk [vmem:[#allocation7 + $0x4] sm:$0x3] %vm650_vm5, %v1820_v32 }
 0x58f   :  { %v1877_v43 = vpop.permute.xlu0 %1876 }
 0x590   :  { %1880 = vst.msk [vmem:[#allocation7 + $0x6] sm:$0x3] %vm650_vm5, %v1877_v43 }
 0x591   :  { %2206 = shalt.err (!%p2203_p6)
}
 0x592   :  { %s2207_s15 = scalar_lea.hbm %s3135_s2, 128 }
 0x593   :  { %p2208_p7 = scmp.ne.s32.totalorder %s3135_s2, %s2207_s15  ;;  %p2211_p8 = scmp.lt.u32.totalorder %s2207_s15, %s3135_s2 }
 0x595   :  { %p2213_p9 = pnand %p2211_p8, %p2208_p7 }
 0x597   :  { %2216 = shalt.err (!%p2213_p9)
}
 0x598   :  { %1892 = dma.vmem_to_hbm [thread:$0]  %s1887_s11, 128, %s3135_s2, [#allocation4], %s2224_s19, %s2224_s19, %s2225_s20  }
 0x599   :  { %2221 = dma.done.wait [#allocation4], 128  }
 0x59a   :  { %2222 = vsyncadd [#allocation4], 4294967168 }
 0x59b   :  { %1896 = vsyncpa [#allocation3], 1 }
 0x59c   :  { %1897 = vsyncpa [#allocation6], 1 }
 0x59d   :  { %1898 = vsyncpa [#allocation4], 1 }

</bundles_post_ra>
